<compile_context>
chip_gen: v7x
topology: tpu7x:2x2x1
jax: 0.10.0
libtpu: 0.0.40
codegen_flags: <defaults>
</compile_context>

<pallas_src>
import functools

import jax
import jax.numpy as jnp
from jax.experimental import pallas as pl
from jax.experimental.pallas import tpu as pltpu


def _vmem_capacity_bytes():
    try:
        return int(pltpu.get_tpu_info().vmem_capacity_bytes)
    except Exception:
        return 64 * 1024 * 1024  # conservative fallback (v7x per-TensorCore VMEM)


def _has_bf16_vpu():
    # bf16 VPU/EUP exists on v6e and later; v5e and older are f32-only elementwise.
    try:
        kind = jax.devices()[0].device_kind.lower()
    except Exception:
        return False
    if "tpu" not in kind:
        return False
    return not any(v in kind for v in ("v2", "v3", "v4", "v5"))


def _layer_norm(x, gamma, beta, eps=1e-5):
    # f32 math throughout (matches nn.LayerNorm default eps=1e-5).
    mu = jnp.mean(x, axis=-1, keepdims=True)
    var = jnp.mean((x - mu) ** 2, axis=-1, keepdims=True)
    return (x - mu) * jax.lax.rsqrt(var + eps) * gamma + beta


def _encoder_layer_kernel(xq_ref, xs_ref,
                          wq_ref, bq_ref, wk_ref, bk_ref, wv_ref, bv_ref,
                          wo_ref, bo_ref,
                          w1_ref, b1_ref, w2_ref, b2_ref,
                          g1_ref, be1_ref, g2_ref, be2_ref,
                          o_ref,
                          *, num_heads, softmax_dtype):
    # xq: (1, TQ, D) query/residual rows of this tile; xs: (1, S, D) full sequence.
    xq = xq_ref[0].astype(jnp.float32)                       # (TQ, D) f32 residual stream
    TQ, D = xq.shape
    S = xs_ref.shape[1]
    H = num_heads
    hd = D // H

    xq_bf = xq.astype(jnp.bfloat16)
    xs_bf = xs_ref[0].astype(jnp.bfloat16)                   # (S, D) key/value rows

    # ---- projections: bf16 MXU operands, f32 accumulation, bias added once ----
    # wq / bq are pre-scaled by 1/sqrt(hd) at init time (no in-kernel scale mul).
    q = jnp.dot(xq_bf, wq_ref[...], preferred_element_type=jnp.float32) + bq_ref[...]
    k = jnp.dot(xs_bf, wk_ref[...], preferred_element_type=jnp.float32) + bk_ref[...]
    v = jnp.dot(xs_bf, wv_ref[...], preferred_element_type=jnp.float32) + bv_ref[...]

    # head-major bf16 layout (cast before the relayout so it moves half the bytes)
    qh = q.astype(jnp.bfloat16).reshape(TQ, H, hd).transpose(1, 0, 2)   # (H, TQ, hd)
    kh = k.astype(jnp.bfloat16).reshape(S, H, hd).transpose(1, 0, 2)    # (H, S, hd)
    vh = v.astype(jnp.bfloat16).reshape(S, H, hd).transpose(1, 0, 2)    # (H, S, hd)

    # ---- attention: batched-head einsums, f32 accumulation ----
    scores = jnp.einsum('hqd,hkd->hqk', qh, kh,
                        preferred_element_type=jnp.float32)             # (H, TQ, S) f32
    scores = scores - jnp.max(scores, axis=-1, keepdims=True)           # max-sub in f32
    p = jnp.exp(scores.astype(softmax_dtype))       # unnormalized probs (bf16 on v6e/v7x)
    row_sum = jnp.sum(p, axis=-1, keepdims=True, dtype=jnp.float32)     # (H, TQ, 1) f32

    ctx = jnp.einsum('hqk,hkd->hqd', p.astype(jnp.bfloat16), vh,
                     preferred_element_type=jnp.float32)                # (H, TQ, hd) f32
    # normalize AFTER the PV matmul: H*TQ*hd multiplies instead of H*TQ*S.
    ctx = ctx * pl.reciprocal(row_sum, approx=True)

    attn = ctx.astype(jnp.bfloat16).transpose(1, 0, 2).reshape(TQ, D)
    attn = jnp.dot(attn, wo_ref[...], preferred_element_type=jnp.float32) + bo_ref[...]

    # residual + LayerNorm 1 (dropout = identity in eval mode)
    x1 = _layer_norm(xq + attn, g1_ref[...], be1_ref[...])

    # ---- position-wise feed-forward ----
    h1 = jnp.dot(x1.astype(jnp.bfloat16), w1_ref[...],
                 preferred_element_type=jnp.float32) + b1_ref[...]
    h1 = jnp.maximum(h1, 0.0)                                            # ReLU
    ff = jnp.dot(h1.astype(jnp.bfloat16), w2_ref[...],
                 preferred_element_type=jnp.float32) + b2_ref[...]

    # residual + LayerNorm 2
    out = _layer_norm(x1 + ff, g2_ref[...], be2_ref[...])
    o_ref[0] = out.astype(o_ref.dtype)


def encoder_layer(x, params, *, num_heads, q_tile=None):
    """x: (B, S, D) float32.  params: dict of weights (see init_params)."""
    B, S, D = x.shape
    d_ff = params["w1"].shape[1]
    assert D % num_heads == 0, "d_model must be divisible by num_heads"

    capacity = _vmem_capacity_bytes()

    # Per-generation sequence (query) tile: larger where VMEM is larger
    # (v5e/v6e: 128 MiB physical; v7x: 64 MiB per TensorCore).
    if q_tile is None:
        q_tile = 512 if capacity >= 96 * (1 << 20) else 256
    tq = min(q_tile, S)
    if S % tq != 0 or (tq != S and tq % 8 != 0):
        tq = S                      # single Q tile keeps the (8,128) block rules
    n_q = S // tq

    softmax_dtype = jnp.bfloat16 if _has_bf16_vpu() else jnp.float32

    kernel = functools.partial(_encoder_layer_kernel, num_heads=num_heads,
                               softmax_dtype=softmax_dtype)

    # grid-invariant weights/biases: single-buffered (no double buffering of
    # constant data -> halves their VMEM footprint).
    def wspec(shape):
        return pl.BlockSpec(shape, lambda b, q: (0, 0), pipeline_mode=pl.Buffered(1))

    # ---- VMEM budget: single-counted per-step estimate + headroom vs. capacity ----
    bf16, f32 = 2, 4
    H, hd = num_heads, D // num_heads
    p_bytes = bf16 if softmax_dtype == jnp.bfloat16 else f32
    weight_b = (4 * D * D + 2 * D * d_ff) * bf16             # single-buffered weights
    small_b = (9 * D + d_ff) * f32                            # biases + LN params
    io_b = 2 * (tq * D + S * D + tq * D) * f32                # x tile, x full, out (2 bufs)
    interm_b = (H * tq * S * (f32 + p_bytes)                  # scores + p
                + 3 * S * D * (f32 + bf16)                    # q/k/v + bf16 head views
                + H * tq * hd * (f32 + bf16)                  # ctx
                + tq * d_ff * (f32 + bf16)                    # h1
                + 6 * tq * D * f32)                           # attn/x1/ff/out slabs
    est = weight_b + small_b + io_b + interm_b
    vmem_limit = int(min(0.85 * capacity, max(32 * (1 << 20), 1.25 * est)))

    grid_spec = pltpu.PrefetchScalarGridSpec(
        num_scalar_prefetch=0,
        grid=(B, n_q),
        in_specs=[
            pl.BlockSpec((1, tq, D), lambda b, q: (b, q, 0)),   # x (query/residual tile)
            pl.BlockSpec((1, S, D), lambda b, q: (b, 0, 0)),    # x (full seq: K/V source)
            wspec((D, D)), wspec((1, D)),                       # wq (pre-scaled), bq
            wspec((D, D)), wspec((1, D)),                       # wk, bk
            wspec((D, D)), wspec((1, D)),                       # wv, bv
            wspec((D, D)), wspec((1, D)),                       # wo, bo
            wspec((D, d_ff)), wspec((1, d_ff)),                 # w1, b1
            wspec((d_ff, D)), wspec((1, D)),                    # w2, b2
            wspec((1, D)), wspec((1, D)),                       # ln1 gamma, beta
            wspec((1, D)), wspec((1, D)),                       # ln2 gamma, beta
        ],
        out_specs=pl.BlockSpec((1, tq, D), lambda b, q: (b, q, 0)),
    )

    return pl.pallas_call(
        kernel,
        out_shape=jax.ShapeDtypeStruct((B, S, D), x.dtype),
        grid_spec=grid_spec,
        compiler_params=pltpu.CompilerParams(
            dimension_semantics=("parallel", "parallel"),
            vmem_limit_bytes=vmem_limit),
    )(x, x,
      params["wq"], params["bq"], params["wk"], params["bk"],
      params["wv"], params["bv"], params["wo"], params["bo"],
      params["w1"], params["b1"], params["w2"], params["b2"],
      params["ln1_g"], params["ln1_b"], params["ln2_g"], params["ln2_b"])


def init_params(key, d_model, d_ff, num_heads):
    """Random init matching the PyTorch parameterization.

    Note: wq / bq are stored pre-scaled by 1/sqrt(head_dim) (mathematically
    identical to scaling q @ k^T in the forward); apply the same fold when
    loading real PyTorch weights.  Weights are stored bf16 (MXU operand dtype).
    """
    ks = jax.random.split(key, 6)
    s = 0.02
    wdt = jnp.bfloat16
    hd = d_model // num_heads
    scale = 1.0 / float(hd) ** 0.5

    def w(k, shape, mult=1.0):
        return (mult * s * jax.random.normal(k, shape, jnp.float32)).astype(wdt)

    return {
        "wq": w(ks[0], (d_model, d_model), mult=scale),
        "bq": jnp.zeros((1, d_model), jnp.float32),       # zero, so pre-scale is a no-op
        "wk": w(ks[1], (d_model, d_model)),
        "bk": jnp.zeros((1, d_model), jnp.float32),
        "wv": w(ks[2], (d_model, d_model)),
        "bv": jnp.zeros((1, d_model), jnp.float32),
        "wo": w(ks[3], (d_model, d_model)),
        "bo": jnp.zeros((1, d_model), jnp.float32),
        "w1": w(ks[4], (d_model, d_ff)),
        "b1": jnp.zeros((1, d_ff), jnp.float32),
        "w2": w(ks[5], (d_ff, d_model)),
        "b2": jnp.zeros((1, d_model), jnp.float32),
        "ln1_g": jnp.ones((1, d_model), jnp.float32),
        "ln1_b": jnp.zeros((1, d_model), jnp.float32),
        "ln2_g": jnp.ones((1, d_model), jnp.float32),
        "ln2_b": jnp.zeros((1, d_model), jnp.float32),
    }


if __name__ == "__main__":
    B, S, d_model, num_heads, d_ff = 2, 8, 32, 4, 64

    key = jax.random.PRNGKey(0)
    kx, kp = jax.random.split(key)
    x = jax.random.normal(kx, (B, S, d_model), jnp.float32)
    params = init_params(kp, d_model, d_ff, num_heads)

    out = encoder_layer(x, params, num_heads=num_heads)
    jax.block_until_ready(out)
    assert out.shape == (B, S, d_model), out.shape
    assert bool(jnp.all(jnp.isfinite(out)))
    print("KERNEL_OK")
</pallas_src>

<mosaic_0001>
module attributes {stable_mosaic.version = 11 : i64} {
  func.func @_encoder_layer_kernel(%arg0: i32, %arg1: i32, %arg2: memref<1x8x32xf32, #tpu.memory_space<vmem>>, %arg3: memref<1x8x32xf32, #tpu.memory_space<vmem>>, %arg4: memref<32x32xbf16, #tpu.memory_space<vmem>>, %arg5: memref<1x32xf32, #tpu.memory_space<vmem>>, %arg6: memref<32x32xbf16, #tpu.memory_space<vmem>>, %arg7: memref<1x32xf32, #tpu.memory_space<vmem>>, %arg8: memref<32x32xbf16, #tpu.memory_space<vmem>>, %arg9: memref<1x32xf32, #tpu.memory_space<vmem>>, %arg10: memref<32x32xbf16, #tpu.memory_space<vmem>>, %arg11: memref<1x32xf32, #tpu.memory_space<vmem>>, %arg12: memref<32x64xbf16, #tpu.memory_space<vmem>>, %arg13: memref<1x64xf32, #tpu.memory_space<vmem>>, %arg14: memref<64x32xbf16, #tpu.memory_space<vmem>>, %arg15: memref<1x32xf32, #tpu.memory_space<vmem>>, %arg16: memref<1x32xf32, #tpu.memory_space<vmem>>, %arg17: memref<1x32xf32, #tpu.memory_space<vmem>>, %arg18: memref<1x32xf32, #tpu.memory_space<vmem>>, %arg19: memref<1x32xf32, #tpu.memory_space<vmem>>, %arg20: memref<1x8x32xf32, #tpu.memory_space<vmem>>) attributes {dimension_semantics = [#tpu.dimension_semantics<parallel>, #tpu.dimension_semantics<parallel>], iteration_bounds = array<i64: 2, 1>, scalar_prefetch = 0 : i64, scratch_operands = 0 : i64, tpu.core_type = #tpu.core_type<tc>, window_params = [{transform_indices = @transform_0, window_bounds = array<i64: 1, 8, 32>}, {transform_indices = @transform_1, window_bounds = array<i64: 1, 8, 32>}, {pipeline_mode = #tpu.pipeline_mode<synchronous>, transform_indices = @transform_2, window_bounds = array<i64: 32, 32>}, {pipeline_mode = #tpu.pipeline_mode<synchronous>, transform_indices = @transform_3, window_bounds = array<i64: 1, 32>}, {pipeline_mode = #tpu.pipeline_mode<synchronous>, transform_indices = @transform_4, window_bounds = array<i64: 32, 32>}, {pipeline_mode = #tpu.pipeline_mode<synchronous>, transform_indices = @transform_5, window_bounds = array<i64: 1, 32>}, {pipeline_mode = #tpu.pipeline_mode<synchronous>, transform_indices = @transform_6, window_bounds = array<i64: 32, 32>}, {pipeline_mode = #tpu.pipeline_mode<synchronous>, transform_indices = @transform_7, window_bounds = array<i64: 1, 32>}, {pipeline_mode = #tpu.pipeline_mode<synchronous>, transform_indices = @transform_8, window_bounds = array<i64: 32, 32>}, {pipeline_mode = #tpu.pipeline_mode<synchronous>, transform_indices = @transform_9, window_bounds = array<i64: 1, 32>}, {pipeline_mode = #tpu.pipeline_mode<synchronous>, transform_indices = @transform_10, window_bounds = array<i64: 32, 64>}, {pipeline_mode = #tpu.pipeline_mode<synchronous>, transform_indices = @transform_11, window_bounds = array<i64: 1, 64>}, {pipeline_mode = #tpu.pipeline_mode<synchronous>, transform_indices = @transform_12, window_bounds = array<i64: 64, 32>}, {pipeline_mode = #tpu.pipeline_mode<synchronous>, transform_indices = @transform_13, window_bounds = array<i64: 1, 32>}, {pipeline_mode = #tpu.pipeline_mode<synchronous>, transform_indices = @transform_14, window_bounds = array<i64: 1, 32>}, {pipeline_mode = #tpu.pipeline_mode<synchronous>, transform_indices = @transform_15, window_bounds = array<i64: 1, 32>}, {pipeline_mode = #tpu.pipeline_mode<synchronous>, transform_indices = @transform_16, window_bounds = array<i64: 1, 32>}, {pipeline_mode = #tpu.pipeline_mode<synchronous>, transform_indices = @transform_17, window_bounds = array<i64: 1, 32>}, {transform_indices = @transform_18, window_bounds = array<i64: 1, 8, 32>}]} {
    %c0 = arith.constant 0 : index
    %c0_0 = arith.constant 0 : index
    %c0_1 = arith.constant 0 : index
    %0 = vector.load %arg2[%c0, %c0_0, %c0_1] : memref<1x8x32xf32, #tpu.memory_space<vmem>>, vector<1x8x32xf32>
    %1 = vector.shape_cast %0 : vector<1x8x32xf32> to vector<8x32xf32>
    %2 = arith.truncf %1 : vector<8x32xf32> to vector<8x32xbf16>
    %c0_2 = arith.constant 0 : index
    %c0_3 = arith.constant 0 : index
    %c0_4 = arith.constant 0 : index
    %3 = vector.load %arg3[%c0_2, %c0_3, %c0_4] : memref<1x8x32xf32, #tpu.memory_space<vmem>>, vector<1x8x32xf32>
    %4 = vector.shape_cast %3 : vector<1x8x32xf32> to vector<8x32xf32>
    %5 = arith.truncf %4 : vector<8x32xf32> to vector<8x32xbf16>
    %c0_5 = arith.constant 0 : index
    %c0_6 = arith.constant 0 : index
    %6 = vector.load %arg4[%c0_5, %c0_6] : memref<32x32xbf16, #tpu.memory_space<vmem>>, vector<32x32xbf16>
    %cst = arith.constant dense<0.000000e+00> : vector<8x32xf32>
    %7 = tpu.matmul %2, %6, %cst {dimension_numbers = #tpu.dot_dimension_numbers<[1], [0], [0], [1], [0, 0, 1, 1], [], []>} : vector<8x32xbf16>, vector<32x32xbf16>, vector<8x32xf32> -> vector<8x32xf32>
    %c0_7 = arith.constant 0 : index
    %c0_8 = arith.constant 0 : index
    %8 = vector.load %arg5[%c0_7, %c0_8] : memref<1x32xf32, #tpu.memory_space<vmem>>, vector<1x32xf32>
    %9 = vector.broadcast %8 : vector<1x32xf32> to vector<8x32xf32>
    %10 = arith.addf %7, %9 : vector<8x32xf32>
    %c0_9 = arith.constant 0 : index
    %c0_10 = arith.constant 0 : index
    %11 = vector.load %arg6[%c0_9, %c0_10] : memref<32x32xbf16, #tpu.memory_space<vmem>>, vector<32x32xbf16>
    %cst_11 = arith.constant dense<0.000000e+00> : vector<8x32xf32>
    %12 = tpu.matmul %5, %11, %cst_11 {dimension_numbers = #tpu.dot_dimension_numbers<[1], [0], [0], [1], [0, 0, 1, 1], [], []>} : vector<8x32xbf16>, vector<32x32xbf16>, vector<8x32xf32> -> vector<8x32xf32>
    %c0_12 = arith.constant 0 : index
    %c0_13 = arith.constant 0 : index
    %13 = vector.load %arg7[%c0_12, %c0_13] : memref<1x32xf32, #tpu.memory_space<vmem>>, vector<1x32xf32>
    %14 = vector.broadcast %13 : vector<1x32xf32> to vector<8x32xf32>
    %15 = arith.addf %12, %14 : vector<8x32xf32>
    %c0_14 = arith.constant 0 : index
    %c0_15 = arith.constant 0 : index
    %16 = vector.load %arg8[%c0_14, %c0_15] : memref<32x32xbf16, #tpu.memory_space<vmem>>, vector<32x32xbf16>
    %cst_16 = arith.constant dense<0.000000e+00> : vector<8x32xf32>
    %17 = tpu.matmul %5, %16, %cst_16 {dimension_numbers = #tpu.dot_dimension_numbers<[1], [0], [0], [1], [0, 0, 1, 1], [], []>} : vector<8x32xbf16>, vector<32x32xbf16>, vector<8x32xf32> -> vector<8x32xf32>
    %c0_17 = arith.constant 0 : index
    %c0_18 = arith.constant 0 : index
    %18 = vector.load %arg9[%c0_17, %c0_18] : memref<1x32xf32, #tpu.memory_space<vmem>>, vector<1x32xf32>
    %19 = vector.broadcast %18 : vector<1x32xf32> to vector<8x32xf32>
    %20 = arith.addf %17, %19 : vector<8x32xf32>
    %21 = arith.truncf %10 : vector<8x32xf32> to vector<8x32xbf16>
    %22 = vector.shape_cast %21 : vector<8x32xbf16> to vector<8x4x8xbf16>
    %23 = tpu.transpose %22, [1, 0, 2] : vector<8x4x8xbf16> -> vector<4x8x8xbf16>
    %24 = arith.truncf %15 : vector<8x32xf32> to vector<8x32xbf16>
    %25 = vector.shape_cast %24 : vector<8x32xbf16> to vector<8x4x8xbf16>
    %26 = tpu.transpose %25, [1, 0, 2] : vector<8x4x8xbf16> -> vector<4x8x8xbf16>
    %27 = arith.truncf %20 : vector<8x32xf32> to vector<8x32xbf16>
    %28 = vector.shape_cast %27 : vector<8x32xbf16> to vector<8x4x8xbf16>
    %29 = tpu.transpose %28, [1, 0, 2] : vector<8x4x8xbf16> -> vector<4x8x8xbf16>
    "tpu.trace_start"() <{level = 10 : i32, message = "hqd,hkd->hqk"}> : () -> ()
    %cst_19 = arith.constant dense<0.000000e+00> : vector<4x8x8xf32>
    %30 = tpu.matmul %23, %26, %cst_19 {dimension_numbers = #tpu.dot_dimension_numbers<[2], [2], [1], [1], [0, 0, 0, 1, 1, 1], [0], [0]>} : vector<4x8x8xbf16>, vector<4x8x8xbf16>, vector<4x8x8xf32> -> vector<4x8x8xf32>
    "tpu.trace_stop"() : () -> ()
    %cst_20 = arith.constant dense<0xFF800000> : vector<4x8xf32>
    %31 = vector.multi_reduction <maximumf>, %30, %cst_20 [2] : vector<4x8x8xf32> to vector<4x8xf32>
    %32 = vector.shape_cast %31 : vector<4x8xf32> to vector<4x8x1xf32>
    %33 = vector.broadcast %32 : vector<4x8x1xf32> to vector<4x8x8xf32>
    %34 = arith.subf %30, %33 : vector<4x8x8xf32>
    %35 = math.exp %34 : vector<4x8x8xf32>
    %cst_21 = arith.constant dense<0.000000e+00> : vector<4x8xf32>
    %36 = vector.multi_reduction <add>, %35, %cst_21 [2] : vector<4x8x8xf32> to vector<4x8xf32>
    %37 = vector.shape_cast %36 : vector<4x8xf32> to vector<4x8x1xf32>
    %38 = arith.truncf %35 : vector<4x8x8xf32> to vector<4x8x8xbf16>
    "tpu.trace_start"() <{level = 10 : i32, message = "hqk,hkd->hqd"}> : () -> ()
    %cst_22 = arith.constant dense<0.000000e+00> : vector<4x8x8xf32>
    %39 = tpu.matmul %38, %29, %cst_22 {dimension_numbers = #tpu.dot_dimension_numbers<[2], [1], [1], [2], [0, 0, 0, 1, 1, 2], [0], [0]>} : vector<4x8x8xbf16>, vector<4x8x8xbf16>, vector<4x8x8xf32> -> vector<4x8x8xf32>
    "tpu.trace_stop"() : () -> ()
    %40 = tpu.reciprocal %37 {approx = true} : vector<4x8x1xf32> -> vector<4x8x1xf32>
    %41 = vector.broadcast %40 : vector<4x8x1xf32> to vector<4x8x8xf32>
    %42 = arith.mulf %39, %41 : vector<4x8x8xf32>
    %43 = arith.truncf %42 : vector<4x8x8xf32> to vector<4x8x8xbf16>
    %44 = tpu.transpose %43, [1, 0, 2] : vector<4x8x8xbf16> -> vector<8x4x8xbf16>
    %45 = vector.shape_cast %44 : vector<8x4x8xbf16> to vector<8x32xbf16>
    %c0_23 = arith.constant 0 : index
    %c0_24 = arith.constant 0 : index
    %46 = vector.load %arg10[%c0_23, %c0_24] : memref<32x32xbf16, #tpu.memory_space<vmem>>, vector<32x32xbf16>
    %cst_25 = arith.constant dense<0.000000e+00> : vector<8x32xf32>
    %47 = tpu.matmul %45, %46, %cst_25 {dimension_numbers = #tpu.dot_dimension_numbers<[1], [0], [0], [1], [0, 0, 1, 1], [], []>} : vector<8x32xbf16>, vector<32x32xbf16>, vector<8x32xf32> -> vector<8x32xf32>
    %c0_26 = arith.constant 0 : index
    %c0_27 = arith.constant 0 : index
    %48 = vector.load %arg11[%c0_26, %c0_27] : memref<1x32xf32, #tpu.memory_space<vmem>>, vector<1x32xf32>
    %49 = vector.broadcast %48 : vector<1x32xf32> to vector<8x32xf32>
    %50 = arith.addf %47, %49 : vector<8x32xf32>
    %51 = arith.addf %1, %50 : vector<8x32xf32>
    %c0_28 = arith.constant 0 : index
    %c0_29 = arith.constant 0 : index
    %52 = vector.load %arg16[%c0_28, %c0_29] : memref<1x32xf32, #tpu.memory_space<vmem>>, vector<1x32xf32>
    %c0_30 = arith.constant 0 : index
    %c0_31 = arith.constant 0 : index
    %53 = vector.load %arg17[%c0_30, %c0_31] : memref<1x32xf32, #tpu.memory_space<vmem>>, vector<1x32xf32>
    %cst_32 = arith.constant dense<0.000000e+00> : vector<8xf32>
    %54 = vector.multi_reduction <add>, %51, %cst_32 [1] : vector<8x32xf32> to vector<8xf32>
    %55 = vector.shape_cast %54 : vector<8xf32> to vector<8x1xf32>
    %cst_33 = arith.constant 3.200000e+01 : f32
    %56 = vector.broadcast %cst_33 : f32 to vector<8x1xf32>
    %57 = arith.divf %55, %56 : vector<8x1xf32>
    %58 = vector.broadcast %57 : vector<8x1xf32> to vector<8x32xf32>
    %59 = arith.subf %51, %58 : vector<8x32xf32>
    %60 = arith.mulf %59, %59 : vector<8x32xf32>
    %cst_34 = arith.constant dense<0.000000e+00> : vector<8xf32>
    %61 = vector.multi_reduction <add>, %60, %cst_34 [1] : vector<8x32xf32> to vector<8xf32>
    %62 = vector.shape_cast %61 : vector<8xf32> to vector<8x1xf32>
    %cst_35 = arith.constant 3.200000e+01 : f32
    %63 = vector.broadcast %cst_35 : f32 to vector<8x1xf32>
    %64 = arith.divf %62, %63 : vector<8x1xf32>
    %65 = vector.broadcast %57 : vector<8x1xf32> to vector<8x32xf32>
    %66 = arith.subf %51, %65 : vector<8x32xf32>
    %cst_36 = arith.constant 9.99999974E-6 : f32
    %67 = vector.broadcast %cst_36 : f32 to vector<8x1xf32>
    %68 = arith.addf %64, %67 : vector<8x1xf32>
    %69 = math.rsqrt %68 : vector<8x1xf32>
    %70 = vector.broadcast %69 : vector<8x1xf32> to vector<8x32xf32>
    %71 = arith.mulf %66, %70 : vector<8x32xf32>
    %72 = vector.broadcast %52 : vector<1x32xf32> to vector<8x32xf32>
    %73 = arith.mulf %71, %72 : vector<8x32xf32>
    %74 = vector.broadcast %53 : vector<1x32xf32> to vector<8x32xf32>
    %75 = arith.addf %73, %74 : vector<8x32xf32>
    %76 = arith.truncf %75 : vector<8x32xf32> to vector<8x32xbf16>
    %c0_37 = arith.constant 0 : index
    %c0_38 = arith.constant 0 : index
    %77 = vector.load %arg12[%c0_37, %c0_38] : memref<32x64xbf16, #tpu.memory_space<vmem>>, vector<32x64xbf16>
    %cst_39 = arith.constant dense<0.000000e+00> : vector<8x64xf32>
    %78 = tpu.matmul %76, %77, %cst_39 {dimension_numbers = #tpu.dot_dimension_numbers<[1], [0], [0], [1], [0, 0, 1, 1], [], []>} : vector<8x32xbf16>, vector<32x64xbf16>, vector<8x64xf32> -> vector<8x64xf32>
    %c0_40 = arith.constant 0 : index
    %c0_41 = arith.constant 0 : index
    %79 = vector.load %arg13[%c0_40, %c0_41] : memref<1x64xf32, #tpu.memory_space<vmem>>, vector<1x64xf32>
    %80 = vector.broadcast %79 : vector<1x64xf32> to vector<8x64xf32>
    %81 = arith.addf %78, %80 : vector<8x64xf32>
    %cst_42 = arith.constant 0.000000e+00 : f32
    %82 = vector.broadcast %cst_42 : f32 to vector<8x64xf32>
    %83 = arith.maximumf %81, %82 : vector<8x64xf32>
    %84 = arith.truncf %83 : vector<8x64xf32> to vector<8x64xbf16>
    %c0_43 = arith.constant 0 : index
    %c0_44 = arith.constant 0 : index
    %85 = vector.load %arg14[%c0_43, %c0_44] : memref<64x32xbf16, #tpu.memory_space<vmem>>, vector<64x32xbf16>
    %cst_45 = arith.constant dense<0.000000e+00> : vector<8x32xf32>
    %86 = tpu.matmul %84, %85, %cst_45 {dimension_numbers = #tpu.dot_dimension_numbers<[1], [0], [0], [1], [0, 0, 1, 1], [], []>} : vector<8x64xbf16>, vector<64x32xbf16>, vector<8x32xf32> -> vector<8x32xf32>
    %c0_46 = arith.constant 0 : index
    %c0_47 = arith.constant 0 : index
    %87 = vector.load %arg15[%c0_46, %c0_47] : memref<1x32xf32, #tpu.memory_space<vmem>>, vector<1x32xf32>
    %88 = vector.broadcast %87 : vector<1x32xf32> to vector<8x32xf32>
    %89 = arith.addf %86, %88 : vector<8x32xf32>
    %90 = arith.addf %75, %89 : vector<8x32xf32>
    %c0_48 = arith.constant 0 : index
    %c0_49 = arith.constant 0 : index
    %91 = vector.load %arg18[%c0_48, %c0_49] : memref<1x32xf32, #tpu.memory_space<vmem>>, vector<1x32xf32>
    %c0_50 = arith.constant 0 : index
    %c0_51 = arith.constant 0 : index
    %92 = vector.load %arg19[%c0_50, %c0_51] : memref<1x32xf32, #tpu.memory_space<vmem>>, vector<1x32xf32>
    %cst_52 = arith.constant dense<0.000000e+00> : vector<8xf32>
    %93 = vector.multi_reduction <add>, %90, %cst_52 [1] : vector<8x32xf32> to vector<8xf32>
    %94 = vector.shape_cast %93 : vector<8xf32> to vector<8x1xf32>
    %cst_53 = arith.constant 3.200000e+01 : f32
    %95 = vector.broadcast %cst_53 : f32 to vector<8x1xf32>
    %96 = arith.divf %94, %95 : vector<8x1xf32>
    %97 = vector.broadcast %96 : vector<8x1xf32> to vector<8x32xf32>
    %98 = arith.subf %90, %97 : vector<8x32xf32>
    %99 = arith.mulf %98, %98 : vector<8x32xf32>
    %cst_54 = arith.constant dense<0.000000e+00> : vector<8xf32>
    %100 = vector.multi_reduction <add>, %99, %cst_54 [1] : vector<8x32xf32> to vector<8xf32>
    %101 = vector.shape_cast %100 : vector<8xf32> to vector<8x1xf32>
    %cst_55 = arith.constant 3.200000e+01 : f32
    %102 = vector.broadcast %cst_55 : f32 to vector<8x1xf32>
    %103 = arith.divf %101, %102 : vector<8x1xf32>
    %104 = vector.broadcast %96 : vector<8x1xf32> to vector<8x32xf32>
    %105 = arith.subf %90, %104 : vector<8x32xf32>
    %cst_56 = arith.constant 9.99999974E-6 : f32
    %106 = vector.broadcast %cst_56 : f32 to vector<8x1xf32>
    %107 = arith.addf %103, %106 : vector<8x1xf32>
    %108 = math.rsqrt %107 : vector<8x1xf32>
    %109 = vector.broadcast %108 : vector<8x1xf32> to vector<8x32xf32>
    %110 = arith.mulf %105, %109 : vector<8x32xf32>
    %111 = vector.broadcast %91 : vector<1x32xf32> to vector<8x32xf32>
    %112 = arith.mulf %110, %111 : vector<8x32xf32>
    %113 = vector.broadcast %92 : vector<1x32xf32> to vector<8x32xf32>
    %114 = arith.addf %112, %113 : vector<8x32xf32>
    %c0_57 = arith.constant 0 : index
    %c0_58 = arith.constant 0 : index
    %c0_59 = arith.constant 0 : index
    %115 = vector.load %arg20[%c0_57, %c0_58, %c0_59] : memref<1x8x32xf32, #tpu.memory_space<vmem>>, vector<1x8x32xf32>
    %116 = vector.shape_cast %115 : vector<1x8x32xf32> to vector<8x32xf32>
    %117 = vector.shape_cast %114 : vector<8x32xf32> to vector<1x8x32xf32>
    tpu.vector_store %arg20[%c0_57, %c0_58, %c0_59], %117 {strides = array<i32>} : memref<1x8x32xf32, #tpu.memory_space<vmem>>, vector<1x8x32xf32>,
    return
  }
  func.func @transform_0(%arg0: i32, %arg1: i32) -> (i32, i32, i32) {
    %c0_i32 = arith.constant 0 : i32
    %c0_i32_0 = arith.constant 0 : i32
    return %arg0, %arg1, %c0_i32 : i32, i32, i32
  }
  func.func @transform_1(%arg0: i32, %arg1: i32) -> (i32, i32, i32) {
    %c0_i32 = arith.constant 0 : i32
    %c0_i32_0 = arith.constant 0 : i32
    %c0_i32_1 = arith.constant 0 : i32
    return %arg0, %c0_i32, %c0_i32_0 : i32, i32, i32
  }
  func.func @transform_2(%arg0: i32, %arg1: i32) -> (i32, i32) {
    %c0_i32 = arith.constant 0 : i32
    %c0_i32_0 = arith.constant 0 : i32
    %c0_i32_1 = arith.constant 0 : i32
    return %c0_i32, %c0_i32_0 : i32, i32
  }
  func.func @transform_3(%arg0: i32, %arg1: i32) -> (i32, i32) {
    %c0_i32 = arith.constant 0 : i32
    %c0_i32_0 = arith.constant 0 : i32
    %c0_i32_1 = arith.constant 0 : i32
    return %c0_i32, %c0_i32_0 : i32, i32
  }
  func.func @transform_4(%arg0: i32, %arg1: i32) -> (i32, i32) {
    %c0_i32 = arith.constant 0 : i32
    %c0_i32_0 = arith.constant 0 : i32
    %c0_i32_1 = arith.constant 0 : i32
    return %c0_i32, %c0_i32_0 : i32, i32
  }
  func.func @transform_5(%arg0: i32, %arg1: i32) -> (i32, i32) {
    %c0_i32 = arith.constant 0 : i32
    %c0_i32_0 = arith.constant 0 : i32
    %c0_i32_1 = arith.constant 0 : i32
    return %c0_i32, %c0_i32_0 : i32, i32
  }
  func.func @transform_6(%arg0: i32, %arg1: i32) -> (i32, i32) {
    %c0_i32 = arith.constant 0 : i32
    %c0_i32_0 = arith.constant 0 : i32
    %c0_i32_1 = arith.constant 0 : i32
    return %c0_i32, %c0_i32_0 : i32, i32
  }
  func.func @transform_7(%arg0: i32, %arg1: i32) -> (i32, i32) {
    %c0_i32 = arith.constant 0 : i32
    %c0_i32_0 = arith.constant 0 : i32
    %c0_i32_1 = arith.constant 0 : i32
    return %c0_i32, %c0_i32_0 : i32, i32
  }
  func.func @transform_8(%arg0: i32, %arg1: i32) -> (i32, i32) {
    %c0_i32 = arith.constant 0 : i32
    %c0_i32_0 = arith.constant 0 : i32
    %c0_i32_1 = arith.constant 0 : i32
    return %c0_i32, %c0_i32_0 : i32, i32
  }
  func.func @transform_9(%arg0: i32, %arg1: i32) -> (i32, i32) {
    %c0_i32 = arith.constant 0 : i32
    %c0_i32_0 = arith.constant 0 : i32
    %c0_i32_1 = arith.constant 0 : i32
    return %c0_i32, %c0_i32_0 : i32, i32
  }
  func.func @transform_10(%arg0: i32, %arg1: i32) -> (i32, i32) {
    %c0_i32 = arith.constant 0 : i32
    %c0_i32_0 = arith.constant 0 : i32
    %c0_i32_1 = arith.constant 0 : i32
    return %c0_i32, %c0_i32_0 : i32, i32
  }
  func.func @transform_11(%arg0: i32, %arg1: i32) -> (i32, i32) {
    %c0_i32 = arith.constant 0 : i32
    %c0_i32_0 = arith.constant 0 : i32
    %c0_i32_1 = arith.constant 0 : i32
    return %c0_i32, %c0_i32_0 : i32, i32
  }
  func.func @transform_12(%arg0: i32, %arg1: i32) -> (i32, i32) {
    %c0_i32 = arith.constant 0 : i32
    %c0_i32_0 = arith.constant 0 : i32
    %c0_i32_1 = arith.constant 0 : i32
    return %c0_i32, %c0_i32_0 : i32, i32
  }
  func.func @transform_13(%arg0: i32, %arg1: i32) -> (i32, i32) {
    %c0_i32 = arith.constant 0 : i32
    %c0_i32_0 = arith.constant 0 : i32
    %c0_i32_1 = arith.constant 0 : i32
    return %c0_i32, %c0_i32_0 : i32, i32
  }
  func.func @transform_14(%arg0: i32, %arg1: i32) -> (i32, i32) {
    %c0_i32 = arith.constant 0 : i32
    %c0_i32_0 = arith.constant 0 : i32
    %c0_i32_1 = arith.constant 0 : i32
    return %c0_i32, %c0_i32_0 : i32, i32
  }
  func.func @transform_15(%arg0: i32, %arg1: i32) -> (i32, i32) {
    %c0_i32 = arith.constant 0 : i32
    %c0_i32_0 = arith.constant 0 : i32
    %c0_i32_1 = arith.constant 0 : i32
    return %c0_i32, %c0_i32_0 : i32, i32
  }
  func.func @transform_16(%arg0: i32, %arg1: i32) -> (i32, i32) {
    %c0_i32 = arith.constant 0 : i32
    %c0_i32_0 = arith.constant 0 : i32
    %c0_i32_1 = arith.constant 0 : i32
    return %c0_i32, %c0_i32_0 : i32, i32
  }
  func.func @transform_17(%arg0: i32, %arg1: i32) -> (i32, i32) {
    %c0_i32 = arith.constant 0 : i32
    %c0_i32_0 = arith.constant 0 : i32
    %c0_i32_1 = arith.constant 0 : i32
    return %c0_i32, %c0_i32_0 : i32, i32
  }
  func.func @transform_18(%arg0: i32, %arg1: i32) -> (i32, i32, i32) {
    %c0_i32 = arith.constant 0 : i32
    %c0_i32_0 = arith.constant 0 : i32
    return %arg0, %arg1, %c0_i32 : i32, i32, i32
  }
}

</mosaic_0001>

<bundles_post_ra>
// kernel: tpu_custom_call.1
= control target key start
LH: loop header
LB: loop body
LE: loop exit
PB: predicated region body
PF: predicated region fallthrough
CT: control target
= control target key end

     0   :  { %s3606_s0 = inlined_call_operand.vmem [shape: f32[2,8,32], index: 0, kind: input, shape index: {}]   ;;  %s3607_s1 = inlined_call_operand.vmem [shape: f32[2,8,32], index: 1, kind: input, shape index: {}]   ;;  %s3608_s2 = inlined_call_operand.vmem [shape: bf16[32,32], index: 2, kind: input, shape index: {}]   ;;  %s3609_s3 = inlined_call_operand.vmem [shape: f32[1,32], index: 3, kind: input, shape index: {}]   ;;  %s3610_s4 = inlined_call_operand.hbm [shape: bf16[32,32], index: 4, kind: input, shape index: {}]   ;;  %s3611_s5 = inlined_call_operand.vmem [shape: f32[1,32], index: 5, kind: input, shape index: {}]   ;;  %s3612_s6 = inlined_call_operand.hbm [shape: bf16[32,32], index: 6, kind: input, shape index: {}]   ;;  %s3613_s7 = inlined_call_operand.hbm [shape: f32[1,32], index: 7, kind: input, shape index: {}]   ;;  %s3614_s8 = inlined_call_operand.hbm [shape: bf16[32,32], index: 8, kind: input, shape index: {}]   ;;  %s3615_s9 = inlined_call_operand.hbm [shape: f32[1,32], index: 9, kind: input, shape index: {}]   ;;  %s3616_s10 = inlined_call_operand.vmem [shape: bf16[32,64], index: 10, kind: input, shape index: {}]   ;;  %s3617_s11 = inlined_call_operand.vmem [shape: f32[1,64], index: 11, kind: input, shape index: {}]   ;;  %s3618_s12 = inlined_call_operand.vmem [shape: bf16[64,32], index: 12, kind: input, shape index: {}]   ;;  %s3619_s13 = inlined_call_operand.vmem [shape: f32[1,32], index: 13, kind: input, shape index: {}]   ;;  %s3620_s14 = inlined_call_operand.vmem [shape: f32[1,32], index: 14, kind: input, shape index: {}]   ;;  %s3621_s15 = inlined_call_operand.vmem [shape: f32[1,32], index: 15, kind: input, shape index: {}]   ;;  %s3622_s16 = inlined_call_operand.vmem [shape: f32[1,32], index: 16, kind: input, shape index: {}]   ;;  %s3623_s17 = inlined_call_operand.vmem [shape: f32[1,32], index: 17, kind: input, shape index: {}]   ;;  %s3624_s18 = inlined_call_operand.hbm [shape: f32[2,8,32], index: 18, kind: output, shape index: {}]  }
   0x1   :  { %3641 = sst [smem:[#allocation25_spill]] %s3606_s0 }
   0x2   :  { %3642 = sst [smem:[#allocation26_spill]] %s3607_s1 }
   0x3   :  { %3643 = sst [smem:[#allocation27_spill]] %s3608_s2 }
   0x4   :  { %3644 = sst [smem:[#allocation28_spill]] %s3612_s6 }
   0x5   :  { %3645 = sst [smem:[#allocation29_spill]] %s3619_s13 }
   0x6   :  { %3646 = sst [smem:[#allocation30_spill]] %s3622_s16 }
   0x7   :  { %3647 = sst [smem:[#allocation31_spill]] %s3623_s17 }
   0x8   :  { %3648 = sst [smem:[#allocation32_spill]] %s3624_s18 }
   0x9   :  { %23 = vsyncpa [#allocation3], 0 }
   0xa   :  { %24 = vsyncpa [#allocation6], 0 }
   0xb   :  { %25 = vsyncpa [#allocation9], 0 }
   0xc   :  { %26 = vsyncpa [#allocation4], 0 }
   0xd   :  { %28 = vsyncpa [#allocation4 + $0x1], 0  ;;  %s3107_s27 = smov 0   ;;  %s3109_s28 = smov 0  }
   0xe   :  { %s3111_s29 = smov 0   ;;  %s3113_s30 = smov 0  }
   0xf   :  { %s3115_s0 = smov 0   ;;  %s3117_s19 = smov 0  }
  0x10 LB: > { %3649 = sst [smem:[#allocation16_spill]] %s2971_s27  ;;  %s2412_s1 = sadd.s32 4294967295, %s2991_s19   ;;  %s2991_s19 = sphi %s3117_s19, %s34_s19   ;;  %s2987_s0 = sphi %s3115_s0, %s3686_s0   ;;  %s2983_s30 = sphi %s3113_s30, %s3685_s30   ;;  %s2979_s29 = sphi %s3111_s29, %s3684_s29   ;;  %s2975_s28 = sphi %s3109_s28, %s3683_s28   ;;  %s2971_s27 = sphi %s3107_s27, %s3682_s27  }
  0x11   : > { %3650 = sst [smem:[#allocation17_spill]] %s2975_s28  ;;  %s2413_s20 = sadd.s32 4294967294, %s2991_s19  }
  0x12   : > { %3651 = sst [smem:[#allocation18_spill]] %s2979_s29  ;;  %s46_s21 = sadd.s32 1, %s2987_s0 }
  0x13   : > { %3652 = sst [smem:[#allocation19_spill]] %s2987_s0  ;;  %s445_s22 = sadd.s32 1, %s2979_s29 }
  0x14   : > { %3653 = sst [smem:[#allocation20_spill]] %s2991_s19  ;;  %p48_p0 = scmp.ge.s32.totalorder %s46_s21, 2 }
  0x15   : > { %p455_p1 = scmp.ne.s32.totalorder %s2979_s29, %s2975_s28  ;;  %p456_p2 = scmp.eq.s32.totalorder %s2412_s1, 1 }
  0x16   : > { %p461_p3 = scmp.ne.s32.totalorder %s2975_s28, %s2971_s27  ;;  %s3688_s21 = smov (%p48_p0, %s46_s21), 0 }
  0x17   : > { %3654 = sst [smem:[#allocation21_spill]] %s3688_s21  ;;  %p3147_p4 = por %p456_p2, %p455_p1 }
  0x18   : > { %p462_p5 = scmp.eq.s32.totalorder %s2413_s20, 1  ;;  %s440_s23 = ssub.s32 %s2987_s0, %s3688_s21 }
  0x19   : > { %s3655_s2 = scalar_select %p3147_p4, 1, 0 }
  0x1a   : > { %p2414_p6 = scmp.ge.s32.totalorder %s2991_s19, 1  ;;  %p443_p7 = scmp.eq.s32.totalorder %s440_s23, 0 }
  0x1b   : > { %3656 = sst [smem:[#allocation22_spill]] %s3655_s2  ;;  %p3154_p8 = por %p462_p5, %p461_p3 }
  0x1c   : > { %p469_p9 = scmp.lt.s32.totalorder %s2991_s19, 3  ;;  %p3166_p11 = scmp.eq.s32.totalorder %s2412_s1, 0 }
  0x1d   : > { %s3657_s24 = scalar_select %p3154_p8, 1, 0 }
  0x1e   : > { %s3160_s25 = scalar_select %p443_p7, %s2979_s29, %s445_s22  }
  0x1f   : > { %3658 = sst [smem:[#allocation23_spill]] %s3657_s24  ;;  %p3162_p10 = pnand %p2414_p6, %p469_p9 }
  0x20   : > { %3659 = sst [smem:[#allocation24_spill]] %s3160_s25  ;;  %s2993_s20 = smov [#allocation5]  }
  0x21   : > { %s3660_s26 = scalar_select %p3162_p10, 1, 0 }
  0x22   : > { %s3661_s27 = scalar_select %p3166_p11, 1, 0 }
  0x23   : > { %p2630_p12 = pneg %p3162_p10  ;;  %s503_s23 = sshll.u32 %s2993_s20, 4  ;;  %s504_s23 = int_to_ptr.vmem [resolvable:$true] %s503_s23 }
  0x24   : > { %s2994_s22 = smov [#allocation8]   ;;  %s3663_s6 = sld [smem:[#allocation28_spill]] }
  0x25   : > { %p3174_p13 = pnand %p3166_p11, %p2630_p12  ;;  %s527_s0 = sshll.u32 %s2994_s22, 4  ;;  %s3178_s0 = int_to_ptr.vmem [resolvable:$true] %s527_s0 }
  0x27   : > { %p3188_p1 = pneg %p3174_p13 }
  0x2a   : > { %s2761_s29 = scalar_lea.hbm %s3663_s6, 256 }
  0x2b   : > { %p2762_p0 = scmp.ne.s32.totalorder %s3663_s6, %s2761_s29  ;;  %p2768_p5 = scmp.lt.u32.totalorder %s2761_s29, %s3663_s6 }
  0x2d   : > { %p2764_p2 = pnand %p3188_p1, %p2762_p0 }
  0x2f   : > { %p2765_p3 = pneg %p2764_p2 }
  0x31   : > { %p2770_p6 = pnand %p2768_p5, %p2765_p3 }
  0x33   : > { %2773 = shalt.err (!%p2770_p6)
}
  0x34   : > { %s2774_s25 = scalar_lea.vmem %s504_s23, 256  ;;  %p2782_p8 = scmp.lt.s32.totalorder %s504_s23, %s504_s23 }
  0x35   : > { %p2775_p7 = scmp.ne.s32.totalorder %s504_s23, %s2774_s25  ;;  %p2783_p4 = scmp.lt.s32.totalorder %s2774_s25, %s2774_s25 }
  0x37   : > { %p2777_p9 = pnand %p2775_p7, %p3188_p1  ;;  %p2784_p11 = por %p2783_p4, %p2782_p8 }
  0x39   : > { %p2778_p12 = pneg %p2777_p9 }
  0x3b   : > { %p2785_p10 = pnand %p2784_p11, %p2778_p12 }
  0x3d   : > { %2788 = shalt.err (!%p2785_p10)
}
  0x3e   : > { %s2995_s19 = smov 64   ;;  %s2996_s24 = smov 4  }
  0x3f   : > { %2636 = dma.hbm_to_vmem [thread:$0]  (!%p3174_p13), %s3663_s6, 256, %s504_s23, [#allocation6], %s2995_s19, %s2995_s19, %s2996_s24  }
  0x40   : > { %s2789_s17 = scalar_lea.hbm %s3614_s8, 256 }
  0x41   : > { %p2790_p4 = scmp.ne.s32.totalorder %s3614_s8, %s2789_s17  ;;  %p2796_p11 = scmp.lt.u32.totalorder %s2789_s17, %s3614_s8 }
  0x43   : > { %p2792_p8 = pnand %p2790_p4, %p3188_p1 }
  0x45   : > { %p2793_p10 = pneg %p2792_p8 }
  0x47   : > { %p2798_p0 = pnand %p2796_p11, %p2793_p10 }
  0x49   : > { %2801 = shalt.err (!%p2798_p0)
}
  0x4a   : > { %s2802_s23 = scalar_lea.vmem %s3178_s0, 256  ;;  %p2810_p6 = scmp.lt.s32.totalorder %s3178_s0, %s3178_s0 }
  0x4b   : > { %p2803_p2 = scmp.ne.s32.totalorder %s3178_s0, %s2802_s23  ;;  %p2811_p7 = scmp.lt.s32.totalorder %s2802_s23, %s2802_s23 }
  0x4d   : > { %p2805_p3 = pnand %p2803_p2, %p3188_p1  ;;  %p2812_p9 = por %p2811_p7, %p2810_p6 }
  0x4f   : > { %p2806_p5 = pneg %p2805_p3 }
  0x51   : > { %p2813_p12 = pnand %p2812_p9, %p2806_p5 }
  0x53   : > { %2816 = shalt.err (!%p2813_p12)
}
  0x54   : > { %2642 = dma.hbm_to_vmem [thread:$0]  (!%p3174_p13), %s3614_s8, 256, %s3178_s0, [#allocation9], %s2995_s19, %s2995_s19, %s2996_s24  }
  0x55   : > { %s2997_s28 = smov [#allocation2]   ;;  %s2998_s18 = smov [#allocation7]  }
  0x56   : > { %s487_s2 = sshll.u32 %s2997_s28, 4  ;;  %s517_s29 = sshll.u32 %s2998_s18, 4  ;;  %s488_s2 = int_to_ptr.vmem [resolvable:$true] %s487_s2  ;;  %s518_s29 = int_to_ptr.vmem [resolvable:$true] %s517_s29 }
  0x57   : > { %s2817_s25 = scalar_lea.hbm %s3610_s4, 256 }
  0x58   : > { %p2818_p4 = scmp.ne.s32.totalorder %s3610_s4, %s2817_s25  ;;  %p2824_p11 = scmp.lt.u32.totalorder %s2817_s25, %s3610_s4 }
  0x5a   : > { %p2820_p8 = pnand %p2818_p4, %p3188_p1 }
  0x5c   : > { %p2821_p10 = pneg %p2820_p8 }
  0x5e   : > { %p2826_p0 = pnand %p2824_p11, %p2821_p10 }
  0x60   : > { %2829 = shalt.err (!%p2826_p0)
}
  0x61   : > { %s2830_s0 = scalar_lea.vmem %s488_s2, 256  ;;  %p2838_p6 = scmp.lt.s32.totalorder %s488_s2, %s488_s2 }
  0x62   : > { %p2831_p2 = scmp.ne.s32.totalorder %s488_s2, %s2830_s0  ;;  %p2839_p7 = scmp.lt.s32.totalorder %s2830_s0, %s2830_s0 }
  0x64   : > { %p2833_p3 = pnand %p2831_p2, %p3188_p1  ;;  %p2840_p9 = por %p2839_p7, %p2838_p6 }
  0x66   : > { %p2834_p5 = pneg %p2833_p3 }
  0x68   : > { %p2841_p12 = pnand %p2840_p9, %p2834_p5 }
  0x6a   : > { %2844 = shalt.err (!%p2841_p12)
}
  0x6b   : > { %2633 = dma.hbm_to_vmem [thread:$0]  (!%p3174_p13), %s3610_s4, 256, %s488_s2, [#allocation3], %s2995_s19, %s2995_s19, %s2996_s24  }
  0x6c   : > { %s2845_s18 = scalar_lea.hbm %s3613_s7, 16 }
  0x6d   : > { %p2846_p4 = scmp.ne.s32.totalorder %s3613_s7, %s2845_s18  ;;  %p2852_p11 = scmp.lt.u32.totalorder %s2845_s18, %s3613_s7 }
  0x6f   : > { %p2848_p8 = pnand %p2846_p4, %p3188_p1 }
  0x71   : > { %p2849_p10 = pneg %p2848_p8 }
  0x73   : > { %p2854_p0 = pnand %p2852_p11, %p2849_p10 }
  0x75   : > { %2857 = shalt.err (!%p2854_p0)
}
  0x76   : > { %s2858_s16 = scalar_lea.vmem %s518_s29, 16  ;;  %s2865_s19 = scalar_lea.vmem %s518_s29, 32 }
  0x77   : > { %p2859_p2 = scmp.ne.s32.totalorder %s518_s29, %s2858_s16  ;;  %p2866_p6 = scmp.lt.s32.totalorder %s518_s29, %s518_s29 }
  0x78   : > { %p2867_p7 = scmp.lt.s32.totalorder %s2865_s19, %s2858_s16 }
  0x79   : > { %p2861_p3 = pnand %p2859_p2, %p3188_p1 }
  0x7a   : > { %p2868_p9 = por %p2867_p7, %p2866_p6 }
  0x7b   : > { %p2862_p5 = pneg %p2861_p3 }
  0x7d   : > { %p2869_p12 = pnand %p2868_p9, %p2862_p5 }
  0x7f   : > { %2872 = shalt.err (!%p2869_p12)
}
  0x80   : > { %2639 = dma.hbm_to_vmem [thread:$0]  (!%p3174_p13), %s3613_s7, 16, %s518_s29, [#allocation6]  }
  0x81   : > { %s2999_s0 = smov [#allocation10]   ;;  %s2873_s28 = scalar_lea.hbm %s3615_s9, 16 }
  0x82   : > { %s541_s6 = sshll.u32 %s2999_s0, 4  ;;  %p2874_p4 = scmp.ne.s32.totalorder %s3615_s9, %s2873_s28  ;;  %s542_s6 = int_to_ptr.vmem [resolvable:$true] %s541_s6 }
  0x83   : > { %p2880_p11 = scmp.lt.u32.totalorder %s2873_s28, %s3615_s9 }
  0x84   : > { %p2876_p8 = pnand %p2874_p4, %p3188_p1 }
  0x86   : > { %p2877_p10 = pneg %p2876_p8 }
  0x88   : > { %p2882_p0 = pnand %p2880_p11, %p2877_p10 }
  0x8a   : > { %2885 = shalt.err (!%p2882_p0)
}
  0x8b   : > { %s2886_s29 = scalar_lea.vmem %s542_s6, 16  ;;  %s2893_s23 = scalar_lea.vmem %s542_s6, 32 }
  0x8c   : > { %p2887_p2 = scmp.ne.s32.totalorder %s542_s6, %s2886_s29  ;;  %p2894_p6 = scmp.lt.s32.totalorder %s542_s6, %s542_s6 }
  0x8d   : > { %p2895_p7 = scmp.lt.s32.totalorder %s2893_s23, %s2886_s29 }
  0x8e   : > { %p2889_p3 = pnand %p2887_p2, %p3188_p1 }
  0x8f   : > { %p2896_p9 = por %p2895_p7, %p2894_p6 }
  0x90   : > { %p2890_p5 = pneg %p2889_p3 }
  0x92   : > { %p2897_p12 = pnand %p2896_p9, %p2890_p5 }
  0x94   : > { %2900 = shalt.err (!%p2897_p12)
}
  0x95   : > { %2645 = dma.hbm_to_vmem [thread:$0]  (!%p3174_p13), %s3615_s9, 16, %s542_s6, [#allocation9]  }
  0x96   : > { %p3665_p4 = scmp.ne.s32.totalorder %s3660_s26, 0 }
  0x97   : > { %p3666_p8 = scmp.ne.s32.totalorder (!%p3665_p4), %s3661_s27, 0 }
  0x98   : > { %595 = sbr.rel (%p3665_p4) target bundleno = 2623 (0xa3f), region = 92 }
  0x9f   : > { %2954 = dma.done.wait (%p3666_p8), [#allocation3], 256  }
  0xa0   : > { %2956 = vsyncadd (%p3666_p8), [#allocation3], 4294967040 }
  0xa1   : > { %2958 = dma.done.wait (%p3666_p8), [#allocation6], 272  }
  0xa2   : > { %2960 = vsyncadd (%p3666_p8), [#allocation6], 4294967024 }
  0xa3   : > { %2962 = dma.done.wait (%p3666_p8), [#allocation9], 272  }
  0xa4   : > { %2964 = vsyncadd (%p3666_p8), [#allocation9], 4294967024  ;;  %p671_p13 = scmp.lt.s32.totalorder %s2983_s30, 1  ;;  %v3000_v0 = vmov 0.0   ;;  %vm3001_vm0 = vmmov 0   ;;  %v2727_v1 = vld [vmem:[#allocation2] sm:$0xff]   ;;  %v894_v34 = vlaneseq }
  0xa5   : > { %2516 = vmatprep.subr.bf16.mxu1 %v3000_v0  ;;  %2508 = vmatprep.subr.bf16.mxu0 %v3000_v0  ;;  %s3667_s24 = sld [smem:[#allocation26_spill]]  ;;  %s3668_s13 = sld [smem:[#allocation27_spill]]  ;;  %v2729_v3 = vld [vmem:[#allocation2 + $0x8] sm:$0xff]   ;;  %vm710_vm1 = vcmask 261120   ;;  %v2731_v9 = vld [vmem:[#allocation5] sm:$0xff]   ;;  %v2732_v10 = vld [vmem:[#allocation5 + $0x8] sm:$0xff]  }
  0xa6   : > { %2520 = vmatprep.mubr.msk.bf16.mxu1 %vm3001_vm0, %v3000_v0  ;;  %s672_s21 = scalar_select %p671_p13, %s2983_s30, 1  ;;  %2512 = vmatprep.mubr.msk.bf16.mxu0 %vm3001_vm0, %v3000_v0  ;;  %v2434_v11 = vld [vmem:[%s3611_s5] ss:$0 sm:$0xff]  ;;  %v3005_v32 = vmov 1983009808   ;;  %v895_v38 = vshrl.u32 %v894_v34, 7 }
  0xa7   : > { %s3669_s18 = sld [smem:[#allocation25_spill]]  ;;  %2517 = vmatpush3.bf16.msra.mxu1 %v2727_v1  ;;  %v2430_v12 = vld [vmem:[%s3609_s3] ss:$0 sm:$0xff]  ;;  %s3004_s27 = smov 112   ;;  %v892_v33 = vunpack.c.l.s4 %v3005_v32  ;;  %v3006_v35 = vmov 1934713408  }
  0xa8   : > { %s2428_s26 = sshll.u32 %s672_s21, 3  ;;  %2518 = vmatprep.subr.bf16.mxu1 %v3000_v0  ;;  %s3002_s21 = smov 104   ;;  %v2438_v25 = vld [vmem:[#allocation7] ss:$0 sm:$0xff]  ;;  %v909_v36 = vunpack.c.l.s4 %v3006_v35  ;;  %v3007_v54 = vmov 0   ;;  %vm1390_vm2 = vcmask 64512  }
  0xa9   : > { %v893_v37 = vunpack.c.0.s8 %v892_v33  ;;  %vm1618_vm3 = vcmask 1043456   ;;  %s3008_s20 = smov 8   ;;  %vm1979_vm4 = vcmask 130048   ;;  %vm1982_vm5 = vcmask 195584   ;;  %s3670_s17 = sld [smem:[#allocation29_spill]] }
  0xaa   : > { %v910_v39 = vunpack.c.0.s8 %v909_v36  ;;  %vm2189_vm6 = vcmask 523264   ;;  %s3671_s28 = sld [smem:[#allocation17_spill]]  ;;  %s3672_s22 = sld [smem:[#allocation22_spill]] }
  0xab   : > { %s681_s2 = scalar_lea.vmem %s3667_s24, %s2428_s26  ;;  %v2728_v2 = vld [vmem:[%s3668_s13] sm:$0xff]   ;;  %v2730_v5 = vld [vmem:[%s3668_s13 + $0x8] sm:$0xff]   ;;  %2519 = vmatpush3.bf16.msra.mxu1 %v2729_v3  ;;  %v3356_v40 = vsub.s32 %v893_v37, %v895_v38  ;;  %s3009_s24 = smov 16  }
  0xac   : > { %2509 = vmatpush3.bf16.msra.mxu0 %v2728_v2  ;;  %v685_v4 = vld [vmem:[%s681_s2] sm:$0xff]  ;;  %2532 = vmatprep.subr.bf16.mxu1 %v3000_v0  ;;  %v3359_v44 = vsub.s32 %v910_v39, %v895_v38  ;;  %s3010_s2 = smov 24   ;;  %s3673_s23 = sld [smem:[#allocation30_spill]] }
  0xad   : > { %s677_s1 = scalar_lea.vmem %s3669_s18, %s2428_s26  ;;  %2510 = vmatprep.subr.bf16.mxu0 %v3000_v0  ;;  %v686_v7 = vpack.c.bf16 %v685_v4, %v685_v4  ;;  %s3003_s26 = smov 120  }
  0xae   : > { %v3326_v6 = vld [vmem:[%s677_s1] sm:$0xff]  ;;  %s3675_s0 = sld [smem:[#allocation32_spill]] }
  0xaf   : > { %v684_v8 = vpack.c.bf16 %v3326_v6, %v3326_v6  ;;  %2521 = vmatmul.mubr.msk.bf16.vlgmr.msra.gmra.mrb[0].mxu1 %vm710_vm1, %v686_v7 }
  0xb0   : > { %2511 = vmatpush3.bf16.msra.mxu0 %v2730_v5  ;;  %2534 = vmatprep.mubr.msk.bf16.mxu1 %vm3001_vm0, %v3000_v0  ;;  %s668_s18 = sand.u32 1, %s3671_s28   ;;  %p3677_p10 = scmp.ne.s32.totalorder %s3672_s22, 0 }
  0xb1   : > { %2524 = vmatprep.subr.bf16.mxu0 %v3000_v0  ;;  %s2427_s1 = sshll.u32 %s668_s18, 3  ;;  %s2265_s28 = scalar_lea.sflag [#allocation4], %s668_s18 }
  0xb3   : > { %2513 = vmatmul.mubr.msk.bf16.vlgmr.msra.gmra.mrb[0].mxu0 %vm710_vm1, %v684_v8 }
  0xb4   : > { %2528 = vmatprep.mubr.msk.bf16.mxu0 %vm3001_vm0, %v3000_v0  ;;  %2525 = vmatpush3.bf16.msra.mxu0 %v2731_v9  ;;  %s3676_s6 = smov %s3675_s0 }
  0xb5   : > { %2526 = vmatprep.subr.bf16.mxu0 %v3000_v0 }
  0xb8   : > { %2527 = vmatpush3.bf16.msra.mxu0 %v2732_v10 }
  0xb9   : > { %2538 = vmatprep.subr.bf16.mxu0 %v3000_v0 }
  0xbb   : > { %2529 = vmatmul.mubr.msk.bf16.vlgmr.msra.gmra.mrb[4].mxu0 %vm710_vm1, %v686_v7 }
  0xbc   : > { %2540 = vmatprep.mubr.msk.bf16.mxu0 %vm3001_vm0, %v3000_v0 }
 0x182   : > { %v814_v13 = vpop.f32.mrb[0].mxu1 }
 0x183   : > { %v815_v14 = vadd.f32 %v2434_v11, %v814_v13  ;;  %v2522_v15 = vpop.f32.mrb[1].mxu1 }
 0x184   : > { %v817_v17 = vpop.f32.mrb[2].mxu1 }
 0x185   : > { %v1052_v20 = vpack.c.bf16 %v815_v14, %v815_v14  ;;  %v2523_v21 = vpop.f32.mrb[3].mxu1 }
 0x186   : > { %v748_v16 = vpop.f32.mrb[0].mxu0 }
 0x187   : > { %v749_v18 = vadd.f32 %v2430_v12, %v748_v16  ;;  %v2514_v19 = vpop.f32.mrb[1].mxu0  ;;  %1058 = vrot.lane.b32.xlu1 %v1052_v20, %s3002_s21  ;;  %1054 = vrot.lane.b32.xlu0 %v1052_v20, %s3003_s26  ;;  %v1066_v53 = vrot.slane %v1052_v20, %v3356_v40 }
 0x188   : > { %v751_v22 = vpop.f32.mrb[2].mxu0 }
 0x189   : > { %v2515_v23 = vpop.f32.mrb[3].mxu0  ;;  %v883_v24 = vpack.c.bf16 %v749_v18, %v749_v18 }
 0x18b   : > { %1056 = vrot.lane.b32.xlu0 %v1052_v20, %s3004_s27  ;;  %885 = vrot.lane.b32.xlu1 %v883_v24, %s3003_s26  ;;  %v897_v61 = vrot.slane %v883_v24, %v3356_v40 }
 0x18e   : > { %v877_v26 = vpop.f32.mrb[4].mxu0 }
 0x18f   : > { %887 = vrot.lane.b32.xlu0 %v883_v24, %s3004_s27  ;;  %889 = vrot.lane.b32.xlu1 %v883_v24, %s3002_s21  ;;  %v878_v27 = vadd.f32 %v2438_v25, %v877_v26  ;;  %v2530_v28 = vpop.f32.mrb[5].mxu0 }
 0x190   : > { %v880_v29 = vpop.f32.mrb[6].mxu0 }
 0x191   : > { %v3353_v30 = vpack.c.bf16 %v878_v27, %v878_v27  ;;  %v2531_v31 = vpop.f32.mrb[7].mxu0 }
 0x193   : > { %1223 = vrot.lane.b32.xlu0 %v3353_v30, %s3003_s26  ;;  %s2469_s26 = sshll.u32 %s2983_s30, 7  ;;  %s3011_s30 = smov [#allocation11]  }
 0x1f9   : > { %v1059_v41 = vpop.permute.xlu1 %1058  ;;  %v1055_v42 = vpop.permute.xlu0 %1054 }
 0x1fa   : > { %v1108_v43 = vrot.slane %v1059_v41, %v3356_v40  ;;  %v1100_v45 = vrot.slane %v1055_v42, %v3356_v40 }
 0x1fc   : > { %v1109_v46 = vcombine.low %v1100_v45, %v1108_v43  ;;  %v1110_v47 = vcombine.high %v1100_v45, %v1108_v43 }
 0x1fd   : > { %v1057_v48 = vpop.permute.xlu0 %1056  ;;  %v886_v49 = vpop.permute.xlu1 %885 }
 0x1fe   : > { %v1117_v50 = vrot.slane %v1109_v46, %v3359_v44  ;;  %v1124_v51 = vrot.slane %v1110_v47, %v3359_v44  ;;  %v1074_v52 = vrot.slane %v1057_v48, %v3356_v40  ;;  %v931_v57 = vrot.slane %v886_v49, %v3356_v40 }
 0x200   : > { %v1125_v55 = vcombine.high %v1117_v50, %v3007_v54  ;;  %v1126_v56 = vcombine.high %v1124_v51, %v3007_v54  ;;  %v1075_v58 = vcombine.low %v1066_v53, %v1074_v52  ;;  %v1076_v59 = vcombine.high %v1066_v53, %v1074_v52 }
 0x201   : > { %v888_v60 = vpop.permute.xlu0 %887  ;;  %v890_v62 = vpop.permute.xlu1 %889  ;;  %v1132_v63 = vshrl.u32 %v1117_v50, 16  ;;  %v1148_v1 = vshrl.u32 %v1124_v51, 16 }
 0x202   : > { %v905_v2 = vrot.slane %v888_v60, %v3356_v40  ;;  %v939_v3 = vrot.slane %v890_v62, %v3356_v40  ;;  %v1140_v4 = vshrl.u32 %v1125_v55, 16  ;;  %v1156_v5 = vshrl.u32 %v1126_v56, 16 }
 0x203   : > { %v1083_v7 = vrot.slane %v1075_v58, %v3359_v44  ;;  %v1090_v8 = vrot.slane %v1076_v59, %v3359_v44 }
 0x204   : > { %v906_v9 = vcombine.low %v897_v61, %v905_v2  ;;  %v907_v10 = vcombine.high %v897_v61, %v905_v2  ;;  %v940_v11 = vcombine.low %v931_v57, %v939_v3  ;;  %v941_v12 = vcombine.high %v931_v57, %v939_v3 }
 0x205   : > { %v1091_v13 = vcombine.high %v1083_v7, %v3007_v54  ;;  %v1092_v14 = vcombine.high %v1090_v8, %v3007_v54  ;;  %v1129_v15 = vpack.i.b16 %v1117_v50, %v1083_v7  ;;  %v1131_v16 = vshrl.u32 %v1083_v7, 16 }
 0x206   : > { %v1145_v17 = vpack.i.b16 %v1124_v51, %v1090_v8  ;;  %v1147_v18 = vshrl.u32 %v1090_v8, 16  ;;  %v914_v19 = vrot.slane %v906_v9, %v3359_v44  ;;  %v921_v20 = vrot.slane %v907_v10, %v3359_v44 }
 0x207   : > { %v1133_v21 = vpack.i.b16 %v1132_v63, %v1131_v16  ;;  %v1137_v22 = vpack.i.b16 %v1125_v55, %v1091_v13  ;;  %v1139_v23 = vshrl.u32 %v1091_v13, 16  ;;  %v1153_v24 = vpack.i.b16 %v1126_v56, %v1092_v14 }
 0x208   : > { %v1149_v25 = vpack.i.b16 %v1148_v1, %v1147_v18  ;;  %v1155_v26 = vshrl.u32 %v1092_v14, 16  ;;  %v1159_v27 = vcombine.low %v1129_v15, %v1145_v17  ;;  %v922_v28 = vcombine.high %v914_v19, %v3007_v54 }
 0x209   : > { %v1141_v29 = vpack.i.b16 %v1140_v4, %v1139_v23  ;;  %v1167_v31 = vcombine.low %v1137_v22, %v1153_v24  ;;  %v923_v32 = vcombine.high %v921_v20, %v3007_v54  ;;  %v962_v36 = vshrl.u32 %v914_v19, 16 }
 0x20a   : > { %v1157_v33 = vpack.i.b16 %v1156_v5, %v1155_v26  ;;  %v1166_v34 = vrot.slane %v1159_v27, %v3356_v40  ;;  %v1184_v35 = vcombine.low %v1133_v21, %v1149_v25  ;;  %v970_v37 = vshrl.u32 %v922_v28, 16 }
 0x20b   : > { %v978_v38 = vshrl.u32 %v921_v20, 16  ;;  %v948_v39 = vrot.slane %v940_v11, %v3359_v44  ;;  %v955_v41 = vrot.slane %v941_v12, %v3359_v44  ;;  %v986_v43 = vshrl.u32 %v923_v32, 16 }
 0x20c   : > { %v1192_v42 = vcombine.low %v1141_v29, %v1157_v33  ;;  %v1174_v45 = vrot.slane %v1167_v31, %v3356_v40  ;;  %v1191_v46 = vrot.slane %v1184_v35, %v3356_v40 }
 0x20d   : > { %v956_v47 = vcombine.high %v948_v39, %v3007_v54  ;;  %v957_v48 = vcombine.high %v955_v41, %v3007_v54  ;;  %v960_v49 = vpack.i.b16 %v948_v39, %v914_v19  ;;  %v963_v50 = vshrl.u32 %v948_v39, 16 }
 0x20e   : > { %v976_v51 = vpack.i.b16 %v955_v41, %v921_v20  ;;  %v979_v52 = vshrl.u32 %v955_v41, 16  ;;  %v1175_v53 = vcombine.low %v1166_v34, %v1174_v45  ;;  %v1199_v55 = vrot.slane %v1192_v42, %v3356_v40 }
 0x20f   : > { %v964_v56 = vpack.i.b16 %v963_v50, %v962_v36  ;;  %v968_v57 = vpack.i.b16 %v956_v47, %v922_v28  ;;  %v971_v58 = vshrl.u32 %v956_v47, 16  ;;  %v984_v59 = vpack.i.b16 %v957_v48, %v923_v32 }
 0x210   : > { %v980_v60 = vpack.i.b16 %v979_v52, %v978_v38  ;;  %v987_v61 = vshrl.u32 %v957_v48, 16  ;;  %v990_v62 = vcombine.low %v960_v49, %v976_v51  ;;  %v1182_v63 = vrot.slane %v1175_v53, %v3359_v44 }
 0x211   : > { %v972_v1 = vpack.i.b16 %v971_v58, %v970_v37  ;;  %v998_v2 = vcombine.low %v968_v57, %v984_v59  ;;  %v1200_v3 = vcombine.low %v1191_v46, %v1199_v55 }
 0x212   : > { %v988_v4 = vpack.i.b16 %v987_v61, %v986_v43  ;;  %v1015_v5 = vcombine.low %v964_v56, %v980_v60  ;;  %v997_v7 = vrot.slane %v990_v62, %v3356_v40  ;;  %v1212_v11 = vshrl.u32 %v1182_v63, 16 }
 0x213   : > { %v1005_v8 = vrot.slane %v998_v2, %v3356_v40  ;;  %v1207_v9 = vrot.slane %v1200_v3, %v3359_v44  ;;  %v1183_v20 = vcombine.high %v1182_v63, %v3007_v54  ;;  %v1224_v2 = vpop.permute.xlu0 %1223 }
 0x214   : > { %v1023_v10 = vcombine.low %v972_v1, %v988_v4  ;;  %v1022_v16 = vrot.slane %v1015_v5, %v3356_v40 }
 0x215   : > { %v1006_v12 = vcombine.low %v997_v7, %v1005_v8  ;;  %v1211_v13 = vpack.i.b16 %v1207_v9, %v1182_v63  ;;  %v1213_v14 = vshrl.u32 %v1207_v9, 16  ;;  %v1208_v15 = vcombine.high %v1207_v9, %v3007_v54 }
 0x216   : > { %v1030_v17 = vrot.slane %v1023_v10, %v3356_v40  ;;  %v1218_v27 = vshrl.u32 %v1183_v20, 16  ;;  %v1269_v10 = vrot.slane %v1224_v2, %v3356_v40 }
 0x217   : > { %v1395_v18 = vsel %vm1390_vm2, %v1211_v13, 0  ;;  %v1214_v19 = vpack.i.b16 %v1213_v14, %v1212_v11  ;;  %v1013_v23 = vrot.slane %v1006_v12, %v3359_v44  ;;  %v1219_v24 = vshrl.u32 %v1208_v15, 16 }
 0x218   : > { %v1031_v21 = vcombine.low %v1022_v16, %v1030_v17  ;;  %2533 = vmatpush3.bf16.xpose.msra.mxu1 %v1395_v18  ;;  %v1217_v26 = vpack.i.b16 %v1208_v15, %v1183_v20  ;;  %v1235_v13 = vrot.slane %v3353_v30, %v3356_v40 }
 0x219   : > { %v1441_v22 = vsel %vm1390_vm2, %v1214_v19, 0  ;;  %2544 = vmatprep.subr.bf16.mxu1 %v3000_v0  ;;  %v1043_v31 = vshrl.u32 %v1013_v23, 16  ;;  %v1220_v32 = vpack.i.b16 %v1219_v24, %v1218_v27  ;;  %v1014_v37 = vcombine.high %v1013_v23, %v3007_v54 }
 0x21a   : > { %2539 = vmatpush3.bf16.xpose.msra.mxu0 %v1441_v22  ;;  %v1038_v25 = vrot.slane %v1031_v21, %v3359_v44  ;;  %v1487_v33 = vsel %vm1390_vm2, %v1217_v26, 0 }
 0x21b   : > { %2550 = vmatprep.subr.bf16.mxu0 %v3000_v0  ;;  %v1533_v36 = vsel %vm1390_vm2, %v1220_v32, 0  ;;  %v1049_v41 = vshrl.u32 %v1014_v37, 16 }
 0x21c   : > { %v1044_v28 = vshrl.u32 %v1038_v25, 16  ;;  %v1042_v29 = vpack.i.b16 %v1038_v25, %v1013_v23  ;;  %v1039_v35 = vcombine.high %v1038_v25, %v3007_v54 }
 0x21e   : > { %v1045_v34 = vpack.i.b16 %v1044_v28, %v1043_v31  ;;  %v1050_v38 = vshrl.u32 %v1039_v35, 16  ;;  %v1048_v39 = vpack.i.b16 %v1039_v35, %v1014_v37 }
 0x21f   : > { %2535 = vmatmul.mubr.msk.bf16.vlgmr.msra.gmra.mrb[4].mxu1 %vm1390_vm2, %v1042_v29 }
 0x220   : > { %2545 = vmatpush3.bf16.xpose.msra.mxu1 %v1487_v33  ;;  %2546 = vmatprep.mubr.msk.bf16.mxu1 %vm3001_vm0, %v3000_v0  ;;  %v1051_v42 = vpack.i.b16 %v1050_v38, %v1049_v41 }
 0x221   : > { %2541 = vmatmul.mubr.msk.bf16.vlgmr.msra.gmra.mrb[8].mxu0 %vm1390_vm2, %v1045_v34  ;;  %2556 = vmatprep.subr.bf16.mxu1 %v3000_v0 }
 0x222   : > { %2551 = vmatpush3.bf16.xpose.msra.mxu0 %v1533_v36  ;;  %2552 = vmatprep.mubr.msk.bf16.mxu0 %vm3001_vm0, %v3000_v0 }
 0x223   : > { %2562 = vmatprep.subr.bf16.mxu0 %v3000_v0 }
 0x227   : > { %2547 = vmatmul.mubr.msk.bf16.vlgmr.msra.gmra.mrb[8].mxu1 %vm1390_vm2, %v1048_v39 }
 0x228   : > { %2558 = vmatprep.mubr.msk.bf16.mxu1 %vm3001_vm0, %v3000_v0 }
 0x229   : > { %2553 = vmatmul.mubr.msk.bf16.vlgmr.msra.gmra.mrb[12].mxu0 %vm1390_vm2, %v1051_v42 }
 0x22a   : > { %2564 = vmatprep.mubr.msk.bf16.mxu0 %vm3001_vm0, %v3000_v0 }
 0x2f2   : > { %v1431_v43 = vpop.f32.mrb[4].mxu1 }
 0x2f3   : > { %v2536_v45 = vpop.f32.mrb[5].mxu1  ;;  %v1575_v46 = vsel %vm1390_vm2, %v1431_v43, -inf }
 0x2f4   : > { %v1434_v47 = vpop.f32.mrb[6].mxu1  ;;  %1576 = vmax.xlane.f32.xlu0 %v1575_v46  ;;  %v1477_v48 = vpop.f32.mrb[8].mxu0 }
 0x2f5   : > { %v2537_v49 = vpop.f32.mrb[7].mxu1  ;;  %v2542_v50 = vpop.f32.mrb[9].mxu0  ;;  %v1578_v51 = vsel %vm1390_vm2, %v1477_v48, -inf }
 0x2f6   : > { %1579 = vmax.xlane.f32.xlu1 %v1578_v51  ;;  %v1480_v52 = vpop.f32.mrb[10].mxu0 }
 0x2f7   : > { %v2543_v53 = vpop.f32.mrb[11].mxu0 }
 0x2fa   : > { %v3422_v55 = vpop.f32.mrb[8].mxu1 }
 0x2fb   : > { %v2548_v56 = vpop.f32.mrb[9].mxu1  ;;  %v1581_v1 = vsel %vm1390_vm2, %v3422_v55, -inf }
 0x2fc   : > { %v1526_v57 = vpop.f32.mrb[10].mxu1  ;;  %v3424_v58 = vpop.f32.mrb[12].mxu0 }
 0x2fd   : > { %v2549_v59 = vpop.f32.mrb[11].mxu1  ;;  %v2554_v60 = vpop.f32.mrb[13].mxu0  ;;  %v1584_v63 = vsel %vm1390_vm2, %v3424_v58, -inf }
 0x2fe   : > { %v1572_v61 = vpop.f32.mrb[14].mxu0 }
 0x2ff   : > { %v2555_v62 = vpop.f32.mrb[15].mxu0 }
 0x307   : > { %1225 = vrot.lane.b32.xlu1 %v3353_v30, %s3004_s27  ;;  %s670_s27 = scalar_lea.vmem [#allocation11], %s2427_s1  ;;  %s2905_s1 = sshll.u32 %s3011_s30, 4  ;;  %s2906_s1 = int_to_ptr.vmem [resolvable:$false] %s2905_s1 }
 0x308   : > { %s2907_s29 = scalar_lea.vmem %s2906_s1, 256 }
 0x30a   : > { %1227 = vrot.lane.b32.xlu0 %v3353_v30, %s3002_s21  ;;  %s3674_s21 = sld [smem:[#allocation31_spill]] }
 0x329   : > { %1585 = vmax.xlane.f32.xlu0 %v1584_v63 }
 0x32b   : > { %1582 = vmax.xlane.f32.xlu1 %v1581_v1 }
 0x381   : > { %v1577_v3 = vpop.xlane.xlu0 %1576 }
 0x382   : > { %v1587_v4 = vsub.f32 %v1431_v43, %v1577_v3 }
 0x383   : > { %v1580_v5 = vpop.xlane.xlu1 %1579 }
 0x384   : > { %v1591_v7 = vmul.f32 1.442695, %v1587_v4  ;;  %v1588_v8 = vsub.f32 %v1477_v48, %v1580_v5 }
 0x385   : > { %v1228_v9 = vpop.permute.xlu0 %1227 }
 0x386   : > { %2741 = vpow2.f32 %v1591_v7  ;;  %v1593_v11 = vmul.f32 1.442695, %v1588_v8  ;;  %v1277_v12 = vrot.slane %v1228_v9, %v3356_v40 }
 0x387   : > { %v1226_v14 = vpop.permute.xlu1 %1225 }
 0x388   : > { %2743 = vpow2.f32 %v1593_v11  ;;  %v1278_v15 = vcombine.low %v1269_v10, %v1277_v12  ;;  %v1279_v16 = vcombine.high %v1269_v10, %v1277_v12  ;;  %v1243_v17 = vrot.slane %v1226_v14, %v3356_v40 }
 0x38a   : > { %v1286_v18 = vrot.slane %v1278_v15, %v3359_v44  ;;  %v1293_v19 = vrot.slane %v1279_v16, %v3359_v44  ;;  %v1244_v20 = vcombine.low %v1235_v13, %v1243_v17  ;;  %v1245_v21 = vcombine.high %v1235_v13, %v1243_v17 }
 0x38c   : > { %v1294_v22 = vcombine.high %v1286_v18, %v3007_v54  ;;  %v1295_v23 = vcombine.high %v1293_v19, %v3007_v54  ;;  %v1252_v24 = vrot.slane %v1244_v20, %v3359_v44  ;;  %v1259_v30 = vrot.slane %v1245_v21, %v3359_v44 }
 0x38d   : > { %v1301_v25 = vshrl.u32 %v1286_v18, 16  ;;  %v1317_v26 = vshrl.u32 %v1293_v19, 16 }
 0x38e   : > { %v1260_v27 = vcombine.high %v1252_v24, %v3007_v54  ;;  %v1261_v28 = vcombine.high %v1259_v30, %v3007_v54  ;;  %v1298_v29 = vpack.i.b16 %v1286_v18, %v1252_v24  ;;  %v1300_v31 = vshrl.u32 %v1252_v24, 16 }
 0x38f   : > { %v1309_v33 = vshrl.u32 %v1294_v22, 16  ;;  %v1325_v34 = vshrl.u32 %v1295_v23, 16  ;;  %v1314_v35 = vpack.i.b16 %v1293_v19, %v1259_v30  ;;  %v1316_v36 = vshrl.u32 %v1259_v30, 16 }
 0x390   : > { %v2742_v32 = vpop.eup %2741  ;;  %v1302_v37 = vpack.i.b16 %v1301_v25, %v1300_v31  ;;  %v1306_v38 = vpack.i.b16 %v1294_v22, %v1260_v27  ;;  %v1308_v39 = vshrl.u32 %v1260_v27, 16  ;;  %v1322_v41 = vpack.i.b16 %v1295_v23, %v1261_v28 }
 0x391   : > { %v1318_v43 = vpack.i.b16 %v1317_v26, %v1316_v36  ;;  %v1324_v45 = vshrl.u32 %v1261_v28, 16  ;;  %v1328_v46 = vcombine.low %v1298_v29, %v1314_v35  ;;  %v1599_v47 = vsel %vm1390_vm2, %v2742_v32, 0.0 }
 0x392   : > { %v2744_v42 = vpop.eup %2743  ;;  %v1310_v48 = vpack.i.b16 %v1309_v33, %v1308_v39  ;;  %v1336_v49 = vcombine.low %v1306_v38, %v1322_v41  ;;  %1600 = vadd.xlane.f32.xlu0 %v1599_v47  ;;  %v1611_v14 = vpack.c.bf16 %v2742_v32, %v2742_v32 }
 0x393   : > { %v1602_v50 = vsel %vm1390_vm2, %v2744_v42, 0.0  ;;  %v1326_v51 = vpack.i.b16 %v1325_v34, %v1324_v45  ;;  %v1353_v52 = vcombine.low %v1302_v37, %v1318_v43  ;;  %v1335_v53 = vrot.slane %v1328_v46, %v3356_v40 }
 0x394   : > { %1603 = vadd.xlane.f32.xlu1 %v1602_v50  ;;  %v1343_v56 = vrot.slane %v1336_v49, %v3356_v40  ;;  %v1612_v17 = vpack.c.bf16 %v2744_v42, %v2744_v42 }
 0x395   : > { %v1361_v57 = vcombine.low %v1310_v48, %v1326_v51  ;;  %v1360_v60 = vrot.slane %v1353_v52, %v3356_v40 }
 0x396   : > { %v1344_v59 = vcombine.low %v1335_v53, %v1343_v56 }
 0x397   : > { %v1368_v61 = vrot.slane %v1361_v57, %v3356_v40 }
 0x398   : > { %v1351_v62 = vrot.slane %v1344_v59, %v3359_v44 }
 0x399   : > { %v1369_v63 = vcombine.low %v1360_v60, %v1368_v61 }
 0x39a   : > { %v1352_v1 = vcombine.high %v1351_v62, %v3007_v54  ;;  %v1381_v4 = vshrl.u32 %v1351_v62, 16 }
 0x39b   : > { %v1376_v2 = vrot.slane %v1369_v63, %v3359_v44 }
 0x39c   : > { %v1387_v8 = vshrl.u32 %v1352_v1, 16 }
 0x39d   : > { %v1380_v3 = vpack.i.b16 %v1376_v2, %v1351_v62  ;;  %v1382_v5 = vshrl.u32 %v1376_v2, 16  ;;  %v1377_v7 = vcombine.high %v1376_v2, %v3007_v54 }
 0x39f   : > { %v1620_v9 = vsel %vm1618_vm3, %v1380_v3, 0  ;;  %v1383_v10 = vpack.i.b16 %v1382_v5, %v1381_v4  ;;  %v1386_v11 = vpack.i.b16 %v1377_v7, %v1352_v1  ;;  %v1388_v12 = vshrl.u32 %v1377_v7, 16 }
 0x3a0   : > { %2557 = vmatpush3.bf16.msra.mxu1 %v1620_v9 }
 0x3a1   : > { %v1666_v13 = vsel %vm1618_vm3, %v1383_v10, 0  ;;  %2568 = vmatprep.subr.bf16.mxu1 %v3000_v0  ;;  %v1389_v15 = vpack.i.b16 %v1388_v12, %v1387_v8  ;;  %v1712_v16 = vsel %vm1618_vm3, %v1386_v11, 0 }
 0x3a2   : > { %2563 = vmatpush3.bf16.msra.mxu0 %v1666_v13 }
 0x3a3   : > { %2559 = vmatmul.mubr.msk.bf16.vlgmr.msra.gmra.mrb[12].mxu1 %vm1390_vm2, %v1611_v14  ;;  %2574 = vmatprep.subr.bf16.mxu0 %v3000_v0  ;;  %v1758_v18 = vsel %vm1618_vm3, %v1389_v15, 0 }
 0x3a4   : > { %2569 = vmatpush3.bf16.msra.mxu1 %v1712_v16  ;;  %2570 = vmatprep.mubr.msk.bf16.mxu1 %vm3001_vm0, %v3000_v0 }
 0x3a5   : > { %2565 = vmatmul.mubr.msk.bf16.vlgmr.msra.gmra.mrb[16].mxu0 %vm1390_vm2, %v1612_v17  ;;  %2580 = vmatprep.subr.bf16.mxu1 %v3000_v0 }
 0x3a6   : > { %2575 = vmatpush3.bf16.msra.mxu0 %v1758_v18  ;;  %2576 = vmatprep.mubr.msk.bf16.mxu0 %vm3001_vm0, %v3000_v0 }
 0x3a7   : > { %2588 = vmatprep.subr.bf16.mxu0 %v3000_v0 }
 0x3b6   : > { %v1586_v19 = vpop.xlane.xlu0 %1585 }
 0x3b7   : > { %v1590_v20 = vsub.f32 %v3424_v58, %v1586_v19 }
 0x3b8   : > { %v1583_v21 = vpop.xlane.xlu1 %1582 }
 0x3b9   : > { %v1597_v22 = vmul.f32 1.442695, %v1590_v20  ;;  %v1589_v23 = vsub.f32 %v3422_v55, %v1583_v21  ;;  %v2733_v55 = vld [vmem:[#allocation8] sm:$0xff]  }
 0x3bb   : > { %2745 = vpow2.f32 %v1597_v22  ;;  %v1595_v24 = vmul.f32 1.442695, %v1589_v23 }
 0x3bd   : > { %2747 = vpow2.f32 %v1595_v24 }
 0x3c5   : > { %v2746_v30 = vpop.eup %2745 }
 0x3c6   : > { %v1608_v25 = vsel %vm1390_vm2, %v2746_v30, 0.0  ;;  %v1614_v26 = vpack.c.bf16 %v2746_v30, %v2746_v30 }
 0x3c7   : > { %v2748_v27 = vpop.eup %2747  ;;  %1609 = vadd.xlane.f32.xlu1 %v1608_v25 }
 0x3c8   : > { %2577 = vmatmul.mubr.msk.bf16.vlgmr.msra.gmra.mrb[20].mxu0 %vm1390_vm2, %v1614_v26  ;;  %v1605_v28 = vsel %vm1390_vm2, %v2748_v27, 0.0  ;;  %v1613_v29 = vpack.c.bf16 %v2748_v27, %v2748_v27 }
 0x3c9   : > { %1606 = vadd.xlane.f32.xlu0 %v1605_v28  ;;  %2592 = vmatprep.mubr.msk.bf16.mxu0 %vm3001_vm0, %v3000_v0 }
 0x3ca   : > { %2571 = vmatmul.mubr.msk.bf16.vlgmr.msra.gmra.mrb[16].mxu1 %vm1390_vm2, %v1613_v29 }
 0x3cb   : > { %2584 = vmatprep.mubr.msk.bf16.mxu1 %vm3001_vm0, %v3000_v0  ;;  %2581 = vmatpush3.bf16.msra.mxu1 %v2733_v55 }
 0x3cc   : > { %2582 = vmatprep.subr.bf16.mxu1 %v3000_v0 }
 0x41f   : > { %v1601_v39 = vpop.xlane.xlu0 %1600 }
 0x421   : > { %v1604_v38 = vpop.xlane.xlu1 %1603 }
 0x422   : > { %2749 = vrcp.f32 %v1604_v38 }
 0x423   : > { %2751 = vrcp.f32 %v1601_v39 }
 0x42c   : > { %v2750_v43 = vpop.eup %2749 }
 0x42d   : > { %v2752_v46 = vpop.eup %2751 }
 0x454   : > { %v1610_v41 = vpop.xlane.xlu1 %1609 }
 0x455   : > { %2753 = vrcp.f32 %v1610_v41 }
 0x456   : > { %v1607_v42 = vpop.xlane.xlu0 %1606 }
 0x457   : > { %2755 = vrcp.f32 %v1607_v42  ;;  %v2734_v42 = vld [vmem:[#allocation8 + $0x8] sm:$0xff]  }
 0x458   : > { %2583 = vmatpush3.bf16.msra.mxu1 %v2734_v42 }
 0x459   : > { %2596 = vmatprep.subr.bf16.mxu1 %v3000_v0 }
 0x45f   : > { %v2754_v48 = vpop.eup %2753 }
 0x461   : > { %v2756_v53 = vpop.eup %2755 }
 0x476   : > { %v1656_v58 = vpop.f32.mrb[12].mxu1 }
 0x477   : > { %v2560_v31 = vpop.f32.mrb[13].mxu1  ;;  %v1804_v47 = vmul.f32 %v2752_v46, %v1656_v58 }
 0x478   : > { %v1659_v32 = vpop.f32.mrb[14].mxu1  ;;  %v1702_v33 = vpop.f32.mrb[16].mxu0 }
 0x479   : > { %v2561_v34 = vpop.f32.mrb[15].mxu1  ;;  %v2566_v35 = vpop.f32.mrb[17].mxu0  ;;  %v1805_v45 = vmul.f32 %v2750_v43, %v1702_v33  ;;  %v1808_v59 = vpack.c.bf16 %v1804_v47, %v1804_v47 }
 0x47a   : > { %v1705_v36 = vpop.f32.mrb[18].mxu0 }
 0x47b   : > { %v2567_v37 = vpop.f32.mrb[19].mxu0  ;;  %v1842_v50 = vpack.c.bf16 %v1805_v45, %v1805_v45  ;;  %v1815_v7 = vrot.slane %v1808_v59, %v3356_v40 }
 0x47d   : > { %v1849_v2 = vrot.slane %v1842_v50, %v3356_v40 }
 0x49b   : > { %v1794_v49 = vpop.f32.mrb[20].mxu0 }
 0x49c   : > { %v1807_v51 = vmul.f32 %v2754_v48, %v1794_v49  ;;  %v2578_v52 = vpop.f32.mrb[21].mxu0 }
 0x49d   : > { %v1748_v56 = vpop.f32.mrb[16].mxu1  ;;  %v1797_v57 = vpop.f32.mrb[22].mxu0 }
 0x49e   : > { %v1850_v60 = vpack.c.bf16 %v1807_v51, %v1807_v51  ;;  %v1806_v61 = vmul.f32 %v2756_v53, %v1748_v56  ;;  %v2572_v62 = vpop.f32.mrb[17].mxu1  ;;  %v2579_v63 = vpop.f32.mrb[23].mxu0 }
 0x49f   : > { %v1751_v1 = vpop.f32.mrb[18].mxu1 }
 0x4a0   : > { %v1857_v3 = vrot.slane %v1850_v60, %v3356_v40  ;;  %v1816_v4 = vpack.c.bf16 %v1806_v61, %v1806_v61  ;;  %v2573_v5 = vpop.f32.mrb[19].mxu1 }
 0x4a2   : > { %v1858_v8 = vcombine.low %v1849_v2, %v1857_v3  ;;  %v1859_v9 = vcombine.high %v1849_v2, %v1857_v3  ;;  %v1823_v10 = vrot.slane %v1816_v4, %v3356_v40  ;;  %v2450_v3 = vld [vmem:[#allocation10] ss:$0 sm:$0xff] }
 0x4a4   : > { %v1866_v11 = vrot.slane %v1858_v8, %v3359_v44  ;;  %v1873_v12 = vrot.slane %v1859_v9, %v3359_v44  ;;  %v1824_v13 = vcombine.low %v1815_v7, %v1823_v10  ;;  %v1825_v14 = vcombine.high %v1815_v7, %v1823_v10 }
 0x4a6   : > { %v1874_v15 = vcombine.high %v1866_v11, %v3007_v54  ;;  %v1832_v16 = vrot.slane %v1824_v13, %v3359_v44  ;;  %v1839_v17 = vrot.slane %v1825_v14, %v3359_v44  ;;  %v1875_v18 = vcombine.high %v1873_v12, %v3007_v54 }
 0x4a7   : > { %v1881_v19 = vshrl.u32 %v1866_v11, 16  ;;  %v1897_v30 = vshrl.u32 %v1873_v12, 16 }
 0x4a8   : > { %v1840_v20 = vcombine.high %v1832_v16, %v3007_v54  ;;  %v1841_v21 = vcombine.high %v1839_v17, %v3007_v54  ;;  %v1878_v22 = vpack.i.b16 %v1866_v11, %v1832_v16  ;;  %v1880_v23 = vshrl.u32 %v1832_v16, 16 }
 0x4a9   : > { %v1889_v24 = vshrl.u32 %v1874_v15, 16  ;;  %v1894_v25 = vpack.i.b16 %v1873_v12, %v1839_v17  ;;  %v1896_v26 = vshrl.u32 %v1839_v17, 16  ;;  %v1905_v58 = vshrl.u32 %v1875_v18, 16  ;;  %v2735_v17 = vld [vmem:[%s3616_s10] sm:$0xff]  }
 0x4aa   : > { %v1882_v27 = vpack.i.b16 %v1881_v19, %v1880_v23  ;;  %v1886_v28 = vpack.i.b16 %v1874_v15, %v1840_v20  ;;  %v1888_v29 = vshrl.u32 %v1840_v20, 16  ;;  %v1902_v55 = vpack.i.b16 %v1875_v18, %v1841_v21  ;;  %2589 = vmatpush3.bf16.msra.mxu0 %v2735_v17  ;;  %v2736_v18 = vld [vmem:[%s3616_s10 + $0x8] sm:$0xff]  }
 0x4ab   : > { %v1898_v31 = vpack.i.b16 %v1897_v30, %v1896_v26  ;;  %v1904_v32 = vshrl.u32 %v1841_v21, 16  ;;  %v1908_v33 = vcombine.low %v1878_v22, %v1894_v25  ;;  %2590 = vmatprep.subr.bf16.mxu0 %v3000_v0  ;;  %v2738_v19 = vld [vmem:[%s3618_s12 + $0x8] sm:$0xff]   ;;  %v2455_v25 = vld [vmem:[%s3621_s15] ss:$0 sm:$0xff] }
 0x4ac   : > { %v1890_v34 = vpack.i.b16 %v1889_v24, %v1888_v29  ;;  %v1916_v35 = vcombine.low %v1886_v28, %v1902_v55  ;;  %v2454_v24 = vld [vmem:[%s3620_s14] ss:$0 sm:$0xff]  ;;  %v2739_v29 = vld [vmem:[%s3618_s12 + $0x10] sm:$0xff]   ;;  %v2740_v55 = vld [vmem:[%s3618_s12 + $0x18] sm:$0xff]  }
 0x4ad   : > { %v1906_v36 = vpack.i.b16 %v1905_v58, %v1904_v32  ;;  %v1933_v37 = vcombine.low %v1882_v27, %v1898_v31  ;;  %v1915_v38 = vrot.slane %v1908_v33, %v3356_v40  ;;  %v2456_v58 = vld [vmem:[%s3617_s11] ss:$0 sm:$0xff] }
 0x4ae   : > { %v1923_v39 = vrot.slane %v1916_v35, %v3356_v40  ;;  %2591 = vmatpush3.bf16.msra.mxu0 %v2736_v18 }
 0x4af   : > { %v1941_v41 = vcombine.low %v1890_v34, %v1906_v36  ;;  %v1940_v45 = vrot.slane %v1933_v37, %v3356_v40 }
 0x4b0   : > { %v1924_v43 = vcombine.low %v1915_v38, %v1923_v39 }
 0x4b1   : > { %v1948_v46 = vrot.slane %v1941_v41, %v3356_v40 }
 0x4b2   : > { %v1931_v47 = vrot.slane %v1924_v43, %v3359_v44 }
 0x4b3   : > { %v1949_v48 = vcombine.low %v1940_v45, %v1948_v46 }
 0x4b4   : > { %v1932_v50 = vcombine.high %v1931_v47, %v3007_v54  ;;  %v1961_v51 = vshrl.u32 %v1931_v47, 16 }
 0x4b5   : > { %v1956_v49 = vrot.slane %v1949_v48, %v3359_v44 }
 0x4b6   : > { %v1967_v60 = vshrl.u32 %v1932_v50, 16 }
 0x4b7   : > { %v1962_v52 = vshrl.u32 %v1956_v49, 16  ;;  %v1957_v53 = vcombine.high %v1956_v49, %v3007_v54  ;;  %v1960_v56 = vpack.i.b16 %v1956_v49, %v1931_v47 }
 0x4b9   : > { %v1963_v57 = vpack.i.b16 %v1962_v52, %v1961_v51  ;;  %v1966_v59 = vpack.i.b16 %v1957_v53, %v1932_v50  ;;  %v1968_v61 = vshrl.u32 %v1957_v53, 16 }
 0x4bb   : > { %1970 = vrot.lane.b32.xlu0 %v1963_v57, %s3008_s20  ;;  %1972 = vrot.lane.b32.xlu1 %v1966_v59, %s3009_s24  ;;  %v1969_v40 = vpack.i.b16 %v1968_v61, %v1967_v60  ;;  %v2466_v59 = vld [vmem:[%s3673_s23] ss:$0 sm:$0xff]  ;;  %s2279_s20 = sshll.u32 %s670_s27, 4  ;;  %s3560_s20 = int_to_ptr.vmem [resolvable:$true] %s2279_s20 }
 0x4bc   : > { %v2467_v61 = vld [vmem:[%s3674_s21] ss:$0 sm:$0xff]  ;;  %s2901_s25 = scalar_lea.vmem %s3560_s20, 128  ;;  %p2908_p2 = scmp.lt.s32.totalorder %s3560_s20, %s2906_s1 }
 0x4bd   : > { %p2902_p1 = scmp.ne.s32.totalorder %s3560_s20, %s2901_s25  ;;  %p2909_p3 = scmp.lt.s32.totalorder %s2907_s29, %s2901_s25 }
 0x4bf   : > { %1974 = vrot.lane.b32.xlu1 %v1969_v40, %s3010_s2  ;;  %p2903_p11 = pnand %p2902_p1, %p3677_p10  ;;  %p2910_p5 = por %p2909_p3, %p2908_p2 }
 0x4c1   : > { %p2904_p0 = pneg %p2903_p11 }
 0x4c3   : > { %p2911_p6 = pnand %p2910_p5, %p2904_p0 }
 0x52d   : > { %v1971_v62 = vpop.permute.xlu0 %1970  ;;  %v1973_v44 = vpop.permute.xlu1 %1972 }
 0x52e   : > { %v1978_v63 = vsel %vm1390_vm2, %v1960_v56, %v1971_v62 }
 0x52f   : > { %v1981_v1 = vsel %vm1979_vm4, %v1978_v63, %v1973_v44 }
 0x531   : > { %v1975_v54 = vpop.permute.xlu1 %1974 }
 0x532   : > { %v1984_v2 = vsel %vm1982_vm5, %v1981_v1, %v1975_v54 }
 0x533   : > { %2585 = vmatmul.mubr.msk.bf16.vlgmr.msra.gmra.mrb[20].mxu1 %vm710_vm1, %v1984_v2 }
 0x534   : > { %2604 = vmatprep.mubr.msk.bf16.mxu1 %vm3001_vm0, %v3000_v0 }
 0x606   : > { %v2044_v4 = vpop.f32.mrb[20].mxu1 }
 0x607   : > { %v2045_v5 = vadd.f32 %v2450_v3, %v2044_v4  ;;  %v2586_v7 = vpop.f32.mrb[21].mxu1 }
 0x608   : > { %v2047_v8 = vpop.f32.mrb[22].mxu1 }
 0x609   : > { %v2587_v9 = vpop.f32.mrb[23].mxu1  ;;  %v2050_v10 = vadd.f32 %v2045_v5, %v3326_v6  ;;  %v2737_v6 = vld [vmem:[%s3618_s12] sm:$0xff]  }
 0x60a   : > { %2597 = vmatpush3.bf16.msra.mxu1 %v2737_v6 }
 0x60b   : > { %v2053_v11 = vsel %vm710_vm1, %v2050_v10, 0.0  ;;  %2598 = vmatprep.subr.bf16.mxu1 %v3000_v0 }
 0x60c   : > { %2054 = vadd.xlane.f32.xlu0 %v2053_v11 }
 0x60e   : > { %2599 = vmatpush3.bf16.msra.mxu1 %v2738_v19 }
 0x60f   : > { %2600 = vmatprep.subr.bf16.mxu1 %v3000_v0 }
 0x612   : > { %2601 = vmatpush3.bf16.msra.mxu1 %v2739_v29 }
 0x613   : > { %2602 = vmatprep.subr.bf16.mxu1 %v3000_v0  ;;  %v2460_v0 = vld [vmem:[%s3670_s17] ss:$0 sm:$0xff]  ;;  %s3558_s17 = scalar_lea.hbm %s3675_s0, %s2469_s26 }
 0x616   : > { %2603 = vmatpush3.bf16.msra.mxu1 %v2740_v55 }
 0x699   : > { %v2055_v12 = vpop.xlane.xlu0 %2054 }
 0x69a   : > { %v2057_v13 = vmul.f32 0.03125, %v2055_v12 }
 0x69c   : > { %v2058_v14 = vsub.f32 %v2050_v10, %v2057_v13 }
 0x69e   : > { %v2059_v15 = vmul.f32 %v2058_v14, %v2058_v14 }
 0x6a0   : > { %v2060_v16 = vsel %vm710_vm1, %v2059_v15, 0.0 }
 0x6a1   : > { %2061 = vadd.xlane.f32.xlu1 %v2060_v16 }
 0x72e   : > { %v2062_v20 = vpop.xlane.xlu1 %2061 }
 0x72f   : > { %v2063_v21 = vmul.f32 0.03125, %v2062_v20 }
 0x731   : > { %v2064_v22 = vadd.f32 1e-05, %v2063_v21 }
 0x733   : > { %2757 = vrsqrt.f32 %v2064_v22 }
 0x73d   : > { %v2758_v23 = vpop.eup %2757 }
 0x73e   : > { %v2066_v30 = vmul.f32 %v2758_v23, %v2058_v14 }
 0x740   : > { %v2073_v26 = vmul.f32 %v2454_v24, %v2066_v30 }
 0x742   : > { %v2080_v27 = vadd.f32 %v2455_v25, %v2073_v26 }
 0x744   : > { %v2081_v28 = vpack.c.bf16 %v2080_v27, %v2080_v27 }
 0x746   : > { %2593 = vmatmul.mubr.msk.bf16.vlgmr.msra.gmra.mrb[24].mxu0 %vm710_vm1, %v2081_v28 }
 0x819   : > { %v2142_v31 = vpop.f32.mrb[24].mxu0 }
 0x81a   : > { %v2143_v32 = vadd.f32 %v2456_v58, %v2142_v31  ;;  %v2594_v33 = vpop.f32.mrb[25].mxu0 }
 0x81b   : > { %v2145_v34 = vpop.f32.mrb[26].mxu0 }
 0x81c   : > { %v2148_v35 = vmax.f32 %v2143_v32, 0.0  ;;  %v2595_v36 = vpop.f32.mrb[27].mxu0 }
 0x81e   : > { %v2149_v37 = vpack.c.bf16 %v2148_v35, %v2148_v35 }
 0x820   : > { %2605 = vmatmul.mubr.msk.bf16.vlgmr.msra.gmra.mrb[24].mxu1 %vm2189_vm6, %v2149_v37 }
 0x8f3   : > { %v2227_v38 = vpop.f32.mrb[24].mxu1 }
 0x8f4   : > { %v2228_v39 = vadd.f32 %v2460_v0, %v2227_v38  ;;  %v2606_v41 = vpop.f32.mrb[25].mxu1 }
 0x8f5   : > { %v2230_v42 = vpop.f32.mrb[26].mxu1 }
 0x8f6   : > { %v2607_v43 = vpop.f32.mrb[27].mxu1  ;;  %v2233_v45 = vadd.f32 %v2228_v39, %v2080_v27 }
 0x8f8   : > { %v2236_v46 = vsel %vm710_vm1, %v2233_v45, 0.0 }
 0x8f9   : > { %2237 = vadd.xlane.f32.xlu0 %v2236_v46 }
 0x986   : > { %v2238_v47 = vpop.xlane.xlu0 %2237 }
 0x987   : > { %v2239_v48 = vmul.f32 0.03125, %v2238_v47 }
 0x989   : > { %v2240_v49 = vsub.f32 %v2233_v45, %v2239_v48 }
 0x98b   : > { %v2241_v50 = vmul.f32 %v2240_v49, %v2240_v49 }
 0x98d   : > { %v2242_v51 = vsel %vm710_vm1, %v2241_v50, 0.0 }
 0x98e   : > { %2243 = vadd.xlane.f32.xlu0 %v2242_v51 }
 0xa1b   : > { %v2244_v52 = vpop.xlane.xlu0 %2243 }
 0xa1c   : > { %v2245_v53 = vmul.f32 0.03125, %v2244_v52 }
 0xa1e   : > { %v2246_v56 = vadd.f32 1e-05, %v2245_v53 }
 0xa20   : > { %2759 = vrsqrt.f32 %v2246_v56 }
 0xa2a   : > { %v2760_v57 = vpop.eup %2759 }
 0xa2b   : > { %v2248_v60 = vmul.f32 %v2760_v57, %v2240_v49 }
 0xa2d   : > { %v2255_v40 = vmul.f32 %v2466_v59, %v2248_v60 }
 0xa2f   : > { %v2262_v62 = vadd.f32 %v2467_v61, %v2255_v40 }
 0xa31   : > { %2263 = vst.msk [vmem:[%s670_s27] sm:$0xff] %vm710_vm1, %v2262_v62 }
 0xa32   : > { %2914 = shalt.err (!%p2911_p6)
}
 0xa33   : > { %s2915_s18 = scalar_lea.hbm %s3558_s17, 128  ;;  %s2919_s19 = scalar_lea.hbm %s3676_s6, 256 }
 0xa34   : > { %p2916_p7 = scmp.ne.s32.totalorder %s3558_s17, %s2915_s18  ;;  %p2920_p4 = scmp.lt.u32.totalorder %s3558_s17, %s3676_s6 }
 0xa35   : > { %p2921_p8 = scmp.lt.u32.totalorder %s2919_s19, %s2915_s18  ;;  %p2923_p1 = scmp.lt.u32.totalorder %s2915_s18, %s3558_s17 }
 0xa36   : > { %p2917_p9 = pnand %p2916_p7, %p3677_p10 }
 0xa37   : > { %p2922_p13 = por %p2921_p8, %p2920_p4 }
 0xa38   : > { %p2918_p12 = pneg %p2917_p9 }
 0xa39   : > { %p2924_p11 = por %p2923_p1, %p2922_p13 }
 0xa3b   : > { %p2925_p0 = pnand %p2924_p11, %p2918_p12 }
 0xa3d   : > { %2928 = shalt.err (!%p2925_p0)
}
 0xa3e   : > { %2628 = dma.vmem_to_hbm [thread:$0]  (%p3677_p10), %s3560_s20, 128, %s3558_s17, %s2265_s28  }
 0xa3f PF: > { %s3678_s27 = sld [smem:[#allocation20_spill]]  ;;  %s3679_s24 = sld [smem:[#allocation16_spill]] }
 0xa40   : > { %s3680_s2 = sld [smem:[#allocation23_spill]] }
 0xa45   : > { %p2660_p2 = scmp.ge.s32.totalorder %s3678_s27, 2  ;;  %s2291_s0 = sand.u32 1, %s3679_s24  }
 0xa46   : > { %p3681_p3 = scmp.ne.s32.totalorder %s3680_s2, 0  ;;  %s2292_s25 = scalar_lea.sflag [#allocation4], %s2291_s0 }
 0xa48   : > { %p2647_p5 = pnand %p2660_p2, %p3681_p3 }
 0xa4a   : > { %2966 = dma.done.wait (!%p2647_p5), %s2292_s25, 128  }
 0xa4b   : > { %2968 = vsyncadd (!%p2647_p5), %s2292_s25, 4294967168  ;;  %s34_s19 = sadd.s32 1, %s3678_s27   ;;  %s3682_s27 = sld [smem:[#allocation17_spill]] }
 0xa4c   : > { %p31_p6 = scmp.ge.s32.totalorder %s34_s19, 4   ;;  %s3683_s28 = sld [smem:[#allocation18_spill]] }
 0xa4d   : > { %s3684_s29 = sld [smem:[#allocation24_spill]]  ;;  %s3685_s30 = sld [smem:[#allocation19_spill]] }
 0xa4e   : > { %s3686_s0 = sld [smem:[#allocation21_spill]]  ;;  %33 = sbr.rel (!%p31_p6) target bundleno = 16 (0x10), region = 151 }
 0xa55   :  { %2297 = vsyncpa [#allocation3], 1 }
 0xa56   :  { %2299 = vsyncpa [#allocation3 + $0x1], 1 }
 0xa57   :  { %2300 = vsyncpa [#allocation6], 1 }
 0xa58   :  { %2301 = vsyncpa [#allocation9], 1 }
 0xa59   :  { %2302 = vsyncpa [#allocation4], 1 }
 0xa5a   :  { %2304 = vsyncpa [#allocation4 + $0x1], 1 }

</bundles_post_ra>
